<compile_context>
chip_gen: v7x
topology: tpu7x:2x2x1
jax: 0.10.0
libtpu: 0.0.40
codegen_flags: <defaults>
</compile_context>

<pallas_src>
import jax
import jax.numpy as jnp
from jax import lax
from jax.experimental import pallas as pl
from jax.experimental.pallas import tpu as pltpu

EPS = 1e-5
LANE = 128


def _round_up(c, m=LANE):
    return ((c + m - 1) // m) * m


# --------------------------------------------------------------------------
# Kernel A: conv1 (3x3, stride s) + optional 1x1 shortcut conv + BN partials
# --------------------------------------------------------------------------
def _make_conv1_kernel(Ho, Wo, Cip, Cop, stride, has_extra):
    HS = stride * (Ho - 1) + 1
    WS = stride * (Wo - 1) + 1
    M = Ho * Wo

    def kernel(*refs):
        if has_extra:
            x_ref, w1_ref, wsc_ref, y1p_ref, sc_ref, stats_ref = refs
        else:
            x_ref, w1_ref, y1p_ref, stats_ref = refs

        x = x_ref[...]                                   # (H+2, W+2, Cip) f32

        # conv1: im2col with taps folded into K (K = 9*Cip) -> one MXU matmul.
        slabs = [x[kh:kh + HS:stride, kw:kw + WS:stride, :]
                 for kh in range(3) for kw in range(3)]
        patches = jnp.concatenate(slabs, axis=-1).reshape(M, 9 * Cip)
        y1 = jnp.dot(patches.astype(jnp.bfloat16), w1_ref[...],
                     preferred_element_type=jnp.float32)  # (M, Cop) f32

        # per-tile BN partials (one-pass sum / sum-of-squares).
        stats_ref[0:1, :] = jnp.sum(y1, axis=0, keepdims=True)
        stats_ref[1:2, :] = jnp.sum(y1 * y1, axis=0, keepdims=True)

        if has_extra:
            # 1x1 strided shortcut conv (padding=0).
            xs = x[1:1 + HS:stride, 1:1 + WS:stride, :].reshape(M, Cip)
            sc = jnp.dot(xs.astype(jnp.bfloat16), wsc_ref[...],
                         preferred_element_type=jnp.float32)
            stats_ref[2:3, :] = jnp.sum(sc, axis=0, keepdims=True)
            stats_ref[3:4, :] = jnp.sum(sc * sc, axis=0, keepdims=True)
            sc_ref[...] = sc.reshape(Ho, Wo, Cop)

        # raw conv1 output into a zero-halo frame: halo-only init (4 thin
        # stores) + one interior store.  Conv bias omitted (BN cancels it).
        zrow = jnp.zeros((1, Wo + 2, Cop), jnp.float32)
        zcol = jnp.zeros((Ho + 2, 1, Cop), jnp.float32)
        y1p_ref[0:1, :, :] = zrow
        y1p_ref[Ho + 1:Ho + 2, :, :] = zrow
        y1p_ref[:, 0:1, :] = zcol
        y1p_ref[:, Wo + 1:Wo + 2, :] = zcol
        y1p_ref[1:Ho + 1, 1:Wo + 1, :] = y1.reshape(Ho, Wo, Cop)

    return kernel


# --------------------------------------------------------------------------
# Kernel B: apply bn1 + ReLU, conv2 (3x3, stride 1) + bn2 partials
# --------------------------------------------------------------------------
def _make_conv2_kernel(Ho, Wo, Cop):
    M = Ho * Wo

    def kernel(y1p_ref, s1_ref, b1_ref, w2_ref, y2_ref, stats_ref):
        y1p = y1p_ref[...]                                # (Ho+2, Wo+2, Cop)
        z = jnp.maximum(y1p * s1_ref[...] + b1_ref[...], 0.0)

        # conv2 needs zero padding AFTER bn1+relu: mask the halo back to 0
        # with an iota mask (no padded scratch, no full zero-fill).
        r = lax.broadcasted_iota(jnp.int32, (Ho + 2, Wo + 2, 1), 0)
        c = lax.broadcasted_iota(jnp.int32, (Ho + 2, Wo + 2, 1), 1)
        interior = (r >= 1) & (r <= Ho) & (c >= 1) & (c <= Wo)
        z = jnp.where(interior, z, 0.0)

        slabs = [z[kh:kh + Ho, kw:kw + Wo, :]
                 for kh in range(3) for kw in range(3)]
        patches = jnp.concatenate(slabs, axis=-1).reshape(M, 9 * Cop)
        y2 = jnp.dot(patches.astype(jnp.bfloat16), w2_ref[...],
                     preferred_element_type=jnp.float32)  # (M, Cop)

        stats_ref[0:1, :] = jnp.sum(y2, axis=0, keepdims=True)
        stats_ref[1:2, :] = jnp.sum(y2 * y2, axis=0, keepdims=True)
        y2_ref[...] = y2.reshape(Ho, Wo, Cop)

    return kernel


# --------------------------------------------------------------------------
# Kernel C: apply bn2 (+ shortcut bn or identity) + add + ReLU
# --------------------------------------------------------------------------
def _make_output_kernel(has_extra):
    if has_extra:
        def kernel(y2_ref, sc_ref, s2_ref, b2_ref, ssc_ref, bsc_ref, out_ref):
            sc = sc_ref[...] * ssc_ref[...] + bsc_ref[...]
            out_ref[...] = jnp.maximum(
                y2_ref[...] * s2_ref[...] + b2_ref[...] + sc, 0.0)
    else:
        def kernel(y2_ref, x_ref, s2_ref, b2_ref, out_ref):
            out_ref[...] = jnp.maximum(
                y2_ref[...] * s2_ref[...] + b2_ref[...] + x_ref[...], 0.0)
    return kernel


def _bn_scale_shift(s, q, count, gamma, beta):
    # Finalize training-mode BN from per-tile sum / sum-of-squares partials.
    mean = s / count
    var = q / count - mean * mean
    scale = gamma * lax.rsqrt(var + EPS)
    shift = beta - mean * scale
    return scale.reshape(1, -1), shift.reshape(1, -1)


def resblk_forward(x_nchw, params, stride=1):
    N, Cin, H, W = x_nchw.shape
    Cout = params["w1"].shape[-1]
    has_extra = "w_sc" in params               # PyTorch: extra iff ch_out != ch_in
    if not has_extra:
        assert Cin == Cout and stride == 1, "identity shortcut needs matching shapes"

    f32 = jnp.float32
    Cip, Cop = _round_up(Cin), _round_up(Cout)
    Ho = (H - 1) // stride + 1
    Wo = (W - 1) // stride + 1
    Hp, Wp = H + 2, W + 2
    Mtot = N * Ho * Wo

    # NCHW -> NHWC (channels on the lane dim), pad channels to a lane multiple,
    # pad H/W by 1 for conv1's padding=1.
    x_nhwc = jnp.transpose(x_nchw, (0, 2, 3, 1)).astype(f32)
    x_cp = jnp.pad(x_nhwc, ((0, 0), (0, 0), (0, 0), (0, Cip - Cin)))
    x_pad = jnp.pad(x_cp, ((0, 0), (1, 1), (1, 1), (0, 0)))

    # im2col-folded, channel-padded, bf16 weights.
    w1 = jnp.pad(params["w1"].astype(f32),
                 ((0, 0), (0, 0), (0, Cip - Cin), (0, Cop - Cout)))
    w1f = w1.reshape(9 * Cip, Cop).astype(jnp.bfloat16)
    w2 = jnp.pad(params["w2"].astype(f32),
                 ((0, 0), (0, 0), (0, Cop - Cout), (0, Cop - Cout)))
    w2f = w2.reshape(9 * Cop, Cop).astype(jnp.bfloat16)

    def vpad(p):
        return jnp.pad(jnp.asarray(p, f32), (0, Cop - Cout))

    cparams = pltpu.CompilerParams(
        dimension_semantics=("parallel",),
        vmem_limit_bytes=32 * 1024 * 1024,   # sized well above per-image tiles
    )

    # ---------------- pass 1: conv1 (+ shortcut conv) + BN partials --------
    S = 4 if has_extra else 2
    k1 = _make_conv1_kernel(Ho, Wo, Cip, Cop, stride, has_extra)

    in_specs = [pl.BlockSpec((None, Hp, Wp, Cip), lambda n: (n, 0, 0, 0)),
                pl.BlockSpec((9 * Cip, Cop), lambda n: (0, 0))]
    inputs = [x_pad, w1f]
    out_shapes = [jax.ShapeDtypeStruct((N, Ho + 2, Wo + 2, Cop), f32)]
    out_specs = [pl.BlockSpec((None, Ho + 2, Wo + 2, Cop), lambda n: (n, 0, 0, 0))]
    if has_extra:
        wsc = jnp.pad(params["w_sc"].astype(f32),
                      ((0, Cip - Cin), (0, Cop - Cout))).astype(jnp.bfloat16)
        in_specs.append(pl.BlockSpec((Cip, Cop), lambda n: (0, 0)))
        inputs.append(wsc)
        out_shapes.append(jax.ShapeDtypeStruct((N, Ho, Wo, Cop), f32))
        out_specs.append(pl.BlockSpec((None, Ho, Wo, Cop), lambda n: (n, 0, 0, 0)))
    out_shapes.append(jax.ShapeDtypeStruct((N, S, Cop), f32))
    out_specs.append(pl.BlockSpec((None, S, Cop), lambda n: (n, 0, 0)))

    res1 = pl.pallas_call(
        k1, grid=(N,), in_specs=in_specs, out_specs=out_specs,
        out_shape=out_shapes, compiler_params=cparams)(*inputs)
    if has_extra:
        y1_pad, sc_raw, stats1 = res1
    else:
        y1_pad, stats1 = res1

    # tiny O(C) cross-tile BN finalize in plain JAX
    t1 = jnp.sum(stats1, axis=0)
    scale1, shift1 = _bn_scale_shift(t1[0], t1[1], Mtot,
                                     vpad(params["g1"]), vpad(params["be1"]))
    if has_extra:
        scale_sc, shift_sc = _bn_scale_shift(t1[2], t1[3], Mtot,
                                             vpad(params["g_sc"]),
                                             vpad(params["be_sc"]))

    # ---------------- pass 2: bn1 + relu + conv2 + bn2 partials ------------
    k2 = _make_conv2_kernel(Ho, Wo, Cop)
    vec_spec = pl.BlockSpec((1, Cop), lambda n: (0, 0))
    img_spec = pl.BlockSpec((None, Ho, Wo, Cop), lambda n: (n, 0, 0, 0))

    y2_raw, stats2 = pl.pallas_call(
        k2, grid=(N,),
        in_specs=[pl.BlockSpec((None, Ho + 2, Wo + 2, Cop), lambda n: (n, 0, 0, 0)),
                  vec_spec, vec_spec,
                  pl.BlockSpec((9 * Cop, Cop), lambda n: (0, 0))],
        out_specs=[img_spec, pl.BlockSpec((None, 2, Cop), lambda n: (n, 0, 0))],
        out_shape=[jax.ShapeDtypeStruct((N, Ho, Wo, Cop), f32),
                   jax.ShapeDtypeStruct((N, 2, Cop), f32)],
        compiler_params=cparams)(y1_pad, scale1, shift1, w2f)

    t2 = jnp.sum(stats2, axis=0)
    scale2, shift2 = _bn_scale_shift(t2[0], t2[1], Mtot,
                                     vpad(params["g2"]), vpad(params["be2"]))

    # ---------------- pass 3: bn2 + shortcut + add + relu ------------------
    k3 = _make_output_kernel(has_extra)
    if has_extra:
        out_pad = pl.pallas_call(
            k3, grid=(N,),
            in_specs=[img_spec, img_spec, vec_spec, vec_spec, vec_spec, vec_spec],
            out_specs=img_spec,
            out_shape=jax.ShapeDtypeStruct((N, Ho, Wo, Cop), f32),
            compiler_params=cparams,
        )(y2_raw, sc_raw, scale2, shift2, scale_sc, shift_sc)
    else:
        out_pad = pl.pallas_call(
            k3, grid=(N,),
            in_specs=[img_spec, img_spec, vec_spec, vec_spec],
            out_specs=img_spec,
            out_shape=jax.ShapeDtypeStruct((N, Ho, Wo, Cop), f32),
            compiler_params=cparams,
        )(y2_raw, x_cp, scale2, shift2)

    # drop channel padding, back to NCHW
    return jnp.transpose(out_pad[..., :Cout], (0, 3, 1, 2))


# ---------------- pure-JAX reference (for correctness checks) ----------------
def resblk_reference(x_nchw, params, stride=1, matmul_dtype=jnp.float32):
    def conv(x, w, b, s, pad):
        y = lax.conv_general_dilated(
            x.astype(matmul_dtype), w.astype(matmul_dtype),
            window_strides=(s, s), padding=pad,
            dimension_numbers=("NCHW", "HWIO", "NCHW"),
            preferred_element_type=jnp.float32,
            precision=lax.Precision.HIGHEST)
        return y + b.reshape(1, -1, 1, 1).astype(jnp.float32)

    def bn(y, g, b):
        mean = jnp.mean(y, axis=(0, 2, 3), keepdims=True)
        var = jnp.mean((y - mean) ** 2, axis=(0, 2, 3), keepdims=True)
        return (y - mean) * lax.rsqrt(var + EPS) * g.reshape(1, -1, 1, 1) \
               + b.reshape(1, -1, 1, 1)

    xf = x_nchw.astype(jnp.float32)
    out = jax.nn.relu(bn(conv(xf, params["w1"], params["b1"], stride,
                              ((1, 1), (1, 1))), params["g1"], params["be1"]))
    out = bn(conv(out, params["w2"], params["b2"], 1, ((1, 1), (1, 1))),
             params["g2"], params["be2"])
    if "w_sc" in params:
        w = params["w_sc"].reshape(1, 1, *params["w_sc"].shape)
        sc = bn(conv(xf, w, params["b_sc"], stride, "VALID"),
                params["g_sc"], params["be_sc"])
    else:
        sc = xf
    return jax.nn.relu(sc + out)


def _make_params(key, Cin, Cout, has_extra):
    ks = jax.random.split(key, 12)
    p = {
        "w1": 0.1 * jax.random.normal(ks[0], (3, 3, Cin, Cout), jnp.float32),
        "b1": 0.05 * jax.random.normal(ks[1], (Cout,), jnp.float32),
        "g1": 1.0 + 0.1 * jax.random.normal(ks[2], (Cout,), jnp.float32),
        "be1": 0.1 * jax.random.normal(ks[3], (Cout,), jnp.float32),
        "w2": 0.1 * jax.random.normal(ks[4], (3, 3, Cout, Cout), jnp.float32),
        "b2": 0.05 * jax.random.normal(ks[5], (Cout,), jnp.float32),
        "g2": 1.0 + 0.1 * jax.random.normal(ks[6], (Cout,), jnp.float32),
        "be2": 0.1 * jax.random.normal(ks[7], (Cout,), jnp.float32),
    }
    if has_extra:
        p.update({
            "w_sc": 0.1 * jax.random.normal(ks[8], (Cin, Cout), jnp.float32),
            "b_sc": 0.05 * jax.random.normal(ks[9], (Cout,), jnp.float32),
            "g_sc": 1.0 + 0.1 * jax.random.normal(ks[10], (Cout,), jnp.float32),
            "be_sc": 0.1 * jax.random.normal(ks[11], (Cout,), jnp.float32),
        })
    return p


if __name__ == "__main__":
    key = jax.random.PRNGKey(0)

    configs = [
        # (name, N, Cin, Cout, H, W, stride)
        ("projection_shortcut", 2, 4, 8, 16, 16, 1),  # extra 1x1-conv/BN branch
        ("identity_shortcut",   2, 8, 8, 16, 16, 1),  # ch_in == ch_out
    ]
    for idx, (name, N, Cin, Cout, H, W, stride) in enumerate(configs):
        kp, kx = jax.random.split(jax.random.fold_in(key, idx))
        params = _make_params(kp, Cin, Cout, has_extra=(Cin != Cout))
        x = jax.random.normal(kx, (N, Cin, H, W), jnp.float32)

        out = jax.block_until_ready(resblk_forward(x, params, stride=stride))
        assert out.shape == (N, Cout, H, W)

        # Tight check vs a reference using the same bf16-input / f32-accumulate
        # matmul precision as the kernel's MXU path.
        ref_bf16 = resblk_reference(x, params, stride, matmul_dtype=jnp.bfloat16)
        err_tight = float(jnp.max(jnp.abs(out - ref_bf16)))
        assert err_tight < 5e-3, f"{name}: err vs matched-precision ref {err_tight}"

        # Sanity check vs the full-f32 reference (true training-mode forward);
        # looser tolerance accounts for bf16 MXU inputs.
        ref_f32 = resblk_reference(x, params, stride, matmul_dtype=jnp.float32)
        err_f32 = float(jnp.max(jnp.abs(out - ref_f32)))
        assert err_f32 < 5e-2, f"{name}: err vs f32 ref {err_f32}"

    print("KERNEL_OK")
</pallas_src>

<mosaic_0001>
module attributes {stable_mosaic.version = 11 : i64} {
  func.func @kernel(%arg0: i32, %arg1: memref<1x18x18x128xf32, #tpu.memory_space<vmem>>, %arg2: memref<1152x128xbf16, #tpu.memory_space<vmem>>, %arg3: memref<128x128xbf16, #tpu.memory_space<vmem>>, %arg4: memref<1x18x18x128xf32, #tpu.memory_space<vmem>>, %arg5: memref<1x16x16x128xf32, #tpu.memory_space<vmem>>, %arg6: memref<1x4x128xf32, #tpu.memory_space<vmem>>) attributes {dimension_semantics = [#tpu.dimension_semantics<parallel>], iteration_bounds = array<i64: 2>, scalar_prefetch = 0 : i64, scratch_operands = 0 : i64, tpu.core_type = #tpu.core_type<tc>, window_params = [{transform_indices = @transform_0, window_bounds = array<i64: 1, 18, 18, 128>}, {pipeline_mode = #tpu.pipeline_mode<synchronous>, transform_indices = @transform_1, window_bounds = array<i64: 1152, 128>}, {pipeline_mode = #tpu.pipeline_mode<synchronous>, transform_indices = @transform_2, window_bounds = array<i64: 128, 128>}, {transform_indices = @transform_3, window_bounds = array<i64: 1, 18, 18, 128>}, {transform_indices = @transform_4, window_bounds = array<i64: 1, 16, 16, 128>}, {transform_indices = @transform_5, window_bounds = array<i64: 1, 4, 128>}]} {
    %c0 = arith.constant 0 : index
    %c0_0 = arith.constant 0 : index
    %c0_1 = arith.constant 0 : index
    %c0_2 = arith.constant 0 : index
    %0 = vector.load %arg1[%c0, %c0_0, %c0_1, %c0_2] : memref<1x18x18x128xf32, #tpu.memory_space<vmem>>, vector<1x18x18x128xf32>
    %1 = vector.shape_cast %0 : vector<1x18x18x128xf32> to vector<18x18x128xf32>
    %2 = vector.extract_strided_slice %1 {offsets = [0, 0, 0], sizes = [16, 16, 128], strides = [1, 1, 1]} : vector<18x18x128xf32> to vector<16x16x128xf32>
    %3 = vector.extract_strided_slice %1 {offsets = [0, 1, 0], sizes = [16, 16, 128], strides = [1, 1, 1]} : vector<18x18x128xf32> to vector<16x16x128xf32>
    %4 = vector.extract_strided_slice %1 {offsets = [0, 2, 0], sizes = [16, 16, 128], strides = [1, 1, 1]} : vector<18x18x128xf32> to vector<16x16x128xf32>
    %5 = vector.extract_strided_slice %1 {offsets = [1, 0, 0], sizes = [16, 16, 128], strides = [1, 1, 1]} : vector<18x18x128xf32> to vector<16x16x128xf32>
    %6 = vector.extract_strided_slice %1 {offsets = [1, 1, 0], sizes = [16, 16, 128], strides = [1, 1, 1]} : vector<18x18x128xf32> to vector<16x16x128xf32>
    %7 = vector.extract_strided_slice %1 {offsets = [1, 2, 0], sizes = [16, 16, 128], strides = [1, 1, 1]} : vector<18x18x128xf32> to vector<16x16x128xf32>
    %8 = vector.extract_strided_slice %1 {offsets = [2, 0, 0], sizes = [16, 16, 128], strides = [1, 1, 1]} : vector<18x18x128xf32> to vector<16x16x128xf32>
    %9 = vector.extract_strided_slice %1 {offsets = [2, 1, 0], sizes = [16, 16, 128], strides = [1, 1, 1]} : vector<18x18x128xf32> to vector<16x16x128xf32>
    %10 = vector.extract_strided_slice %1 {offsets = [2, 2, 0], sizes = [16, 16, 128], strides = [1, 1, 1]} : vector<18x18x128xf32> to vector<16x16x128xf32>
    %11 = tpu.concatenate %2, %3, %4, %5, %6, %7, %8, %9, %10 in 2 : vector<16x16x128xf32>, vector<16x16x128xf32>, vector<16x16x128xf32>, vector<16x16x128xf32>, vector<16x16x128xf32>, vector<16x16x128xf32>, vector<16x16x128xf32>, vector<16x16x128xf32>, vector<16x16x128xf32> -> vector<16x16x1152xf32>
    %12 = vector.shape_cast %11 : vector<16x16x1152xf32> to vector<256x1152xf32>
    %13 = arith.truncf %12 : vector<256x1152xf32> to vector<256x1152xbf16>
    %c0_3 = arith.constant 0 : index
    %c0_4 = arith.constant 0 : index
    %14 = vector.load %arg2[%c0_3, %c0_4] : memref<1152x128xbf16, #tpu.memory_space<vmem>>, vector<1152x128xbf16>
    %cst = arith.constant dense<0.000000e+00> : vector<256x128xf32>
    %15 = tpu.matmul %13, %14, %cst {dimension_numbers = #tpu.dot_dimension_numbers<[1], [0], [0], [1], [0, 0, 1, 1], [], []>} : vector<256x1152xbf16>, vector<1152x128xbf16>, vector<256x128xf32> -> vector<256x128xf32>
    %cst_5 = arith.constant dense<0.000000e+00> : vector<128xf32>
    %16 = vector.multi_reduction <add>, %15, %cst_5 [0] : vector<256x128xf32> to vector<128xf32>
    %17 = vector.shape_cast %16 : vector<128xf32> to vector<1x128xf32>
    %c0_6 = arith.constant 0 : index
    %c0_7 = arith.constant 0 : index
    %c0_8 = arith.constant 0 : index
    %18 = vector.load %arg6[%c0_6, %c0_7, %c0_8] : memref<1x4x128xf32, #tpu.memory_space<vmem>>, vector<1x1x128xf32>
    %19 = vector.shape_cast %18 : vector<1x1x128xf32> to vector<1x128xf32>
    %20 = vector.shape_cast %17 : vector<1x128xf32> to vector<1x1x128xf32>
    tpu.vector_store %arg6[%c0_6, %c0_7, %c0_8], %20 {strides = array<i32>} : memref<1x4x128xf32, #tpu.memory_space<vmem>>, vector<1x1x128xf32>,
    %21 = arith.mulf %15, %15 : vector<256x128xf32>
    %cst_9 = arith.constant dense<0.000000e+00> : vector<128xf32>
    %22 = vector.multi_reduction <add>, %21, %cst_9 [0] : vector<256x128xf32> to vector<128xf32>
    %23 = vector.shape_cast %22 : vector<128xf32> to vector<1x128xf32>
    %c0_10 = arith.constant 0 : index
    %c1 = arith.constant 1 : index
    %c0_11 = arith.constant 0 : index
    %24 = vector.load %arg6[%c0_10, %c1, %c0_11] : memref<1x4x128xf32, #tpu.memory_space<vmem>>, vector<1x1x128xf32>
    %25 = vector.shape_cast %24 : vector<1x1x128xf32> to vector<1x128xf32>
    %26 = vector.shape_cast %23 : vector<1x128xf32> to vector<1x1x128xf32>
    tpu.vector_store %arg6[%c0_10, %c1, %c0_11], %26 {strides = array<i32>} : memref<1x4x128xf32, #tpu.memory_space<vmem>>, vector<1x1x128xf32>,
    %27 = vector.extract_strided_slice %1 {offsets = [1, 1, 0], sizes = [16, 16, 128], strides = [1, 1, 1]} : vector<18x18x128xf32> to vector<16x16x128xf32>
    %28 = vector.shape_cast %27 : vector<16x16x128xf32> to vector<256x128xf32>
    %29 = arith.truncf %28 : vector<256x128xf32> to vector<256x128xbf16>
    %c0_12 = arith.constant 0 : index
    %c0_13 = arith.constant 0 : index
    %30 = vector.load %arg3[%c0_12, %c0_13] : memref<128x128xbf16, #tpu.memory_space<vmem>>, vector<128x128xbf16>
    %cst_14 = arith.constant dense<0.000000e+00> : vector<256x128xf32>
    %31 = tpu.matmul %29, %30, %cst_14 {dimension_numbers = #tpu.dot_dimension_numbers<[1], [0], [0], [1], [0, 0, 1, 1], [], []>} : vector<256x128xbf16>, vector<128x128xbf16>, vector<256x128xf32> -> vector<256x128xf32>
    %cst_15 = arith.constant dense<0.000000e+00> : vector<128xf32>
    %32 = vector.multi_reduction <add>, %31, %cst_15 [0] : vector<256x128xf32> to vector<128xf32>
    %33 = vector.shape_cast %32 : vector<128xf32> to vector<1x128xf32>
    %c0_16 = arith.constant 0 : index
    %c2 = arith.constant 2 : index
    %c0_17 = arith.constant 0 : index
    %34 = vector.load %arg6[%c0_16, %c2, %c0_17] : memref<1x4x128xf32, #tpu.memory_space<vmem>>, vector<1x1x128xf32>
    %35 = vector.shape_cast %34 : vector<1x1x128xf32> to vector<1x128xf32>
    %36 = vector.shape_cast %33 : vector<1x128xf32> to vector<1x1x128xf32>
    tpu.vector_store %arg6[%c0_16, %c2, %c0_17], %36 {strides = array<i32>} : memref<1x4x128xf32, #tpu.memory_space<vmem>>, vector<1x1x128xf32>,
    %37 = arith.mulf %31, %31 : vector<256x128xf32>
    %cst_18 = arith.constant dense<0.000000e+00> : vector<128xf32>
    %38 = vector.multi_reduction <add>, %37, %cst_18 [0] : vector<256x128xf32> to vector<128xf32>
    %39 = vector.shape_cast %38 : vector<128xf32> to vector<1x128xf32>
    %c0_19 = arith.constant 0 : index
    %c3 = arith.constant 3 : index
    %c0_20 = arith.constant 0 : index
    %40 = vector.load %arg6[%c0_19, %c3, %c0_20] : memref<1x4x128xf32, #tpu.memory_space<vmem>>, vector<1x1x128xf32>
    %41 = vector.shape_cast %40 : vector<1x1x128xf32> to vector<1x128xf32>
    %42 = vector.shape_cast %39 : vector<1x128xf32> to vector<1x1x128xf32>
    tpu.vector_store %arg6[%c0_19, %c3, %c0_20], %42 {strides = array<i32>} : memref<1x4x128xf32, #tpu.memory_space<vmem>>, vector<1x1x128xf32>,
    %43 = vector.shape_cast %31 : vector<256x128xf32> to vector<16x16x128xf32>
    %c0_21 = arith.constant 0 : index
    %c0_22 = arith.constant 0 : index
    %c0_23 = arith.constant 0 : index
    %c0_24 = arith.constant 0 : index
    %44 = vector.load %arg5[%c0_21, %c0_22, %c0_23, %c0_24] : memref<1x16x16x128xf32, #tpu.memory_space<vmem>>, vector<1x16x16x128xf32>
    %45 = vector.shape_cast %44 : vector<1x16x16x128xf32> to vector<16x16x128xf32>
    %46 = vector.shape_cast %43 : vector<16x16x128xf32> to vector<1x16x16x128xf32>
    tpu.vector_store %arg5[%c0_21, %c0_22, %c0_23, %c0_24], %46 {strides = array<i32>} : memref<1x16x16x128xf32, #tpu.memory_space<vmem>>, vector<1x16x16x128xf32>,
    %cst_25 = arith.constant 0.000000e+00 : f32
    %47 = vector.broadcast %cst_25 : f32 to vector<1x18x128xf32>
    %cst_26 = arith.constant 0.000000e+00 : f32
    %48 = vector.broadcast %cst_26 : f32 to vector<18x1x128xf32>
    %c0_27 = arith.constant 0 : index
    %c0_28 = arith.constant 0 : index
    %c0_29 = arith.constant 0 : index
    %c0_30 = arith.constant 0 : index
    %49 = vector.load %arg4[%c0_27, %c0_28, %c0_29, %c0_30] : memref<1x18x18x128xf32, #tpu.memory_space<vmem>>, vector<1x1x18x128xf32>
    %50 = vector.shape_cast %49 : vector<1x1x18x128xf32> to vector<1x18x128xf32>
    %51 = vector.shape_cast %47 : vector<1x18x128xf32> to vector<1x1x18x128xf32>
    tpu.vector_store %arg4[%c0_27, %c0_28, %c0_29, %c0_30], %51 {strides = array<i32>} : memref<1x18x18x128xf32, #tpu.memory_space<vmem>>, vector<1x1x18x128xf32>,
    %c0_31 = arith.constant 0 : index
    %c17 = arith.constant 17 : index
    %c0_32 = arith.constant 0 : index
    %c0_33 = arith.constant 0 : index
    %52 = vector.load %arg4[%c0_31, %c17, %c0_32, %c0_33] : memref<1x18x18x128xf32, #tpu.memory_space<vmem>>, vector<1x1x18x128xf32>
    %53 = vector.shape_cast %52 : vector<1x1x18x128xf32> to vector<1x18x128xf32>
    %54 = vector.shape_cast %47 : vector<1x18x128xf32> to vector<1x1x18x128xf32>
    tpu.vector_store %arg4[%c0_31, %c17, %c0_32, %c0_33], %54 {strides = array<i32>} : memref<1x18x18x128xf32, #tpu.memory_space<vmem>>, vector<1x1x18x128xf32>,
    %c0_34 = arith.constant 0 : index
    %c0_35 = arith.constant 0 : index
    %c0_36 = arith.constant 0 : index
    %c0_37 = arith.constant 0 : index
    %55 = vector.load %arg4[%c0_34, %c0_35, %c0_36, %c0_37] : memref<1x18x18x128xf32, #tpu.memory_space<vmem>>, vector<1x18x1x128xf32>
    %56 = vector.shape_cast %55 : vector<1x18x1x128xf32> to vector<18x1x128xf32>
    %57 = vector.shape_cast %48 : vector<18x1x128xf32> to vector<1x18x1x128xf32>
    tpu.vector_store %arg4[%c0_34, %c0_35, %c0_36, %c0_37], %57 {strides = array<i32>} : memref<1x18x18x128xf32, #tpu.memory_space<vmem>>, vector<1x18x1x128xf32>,
    %c0_38 = arith.constant 0 : index
    %c0_39 = arith.constant 0 : index
    %c17_40 = arith.constant 17 : index
    %c0_41 = arith.constant 0 : index
    %58 = vector.load %arg4[%c0_38, %c0_39, %c17_40, %c0_41] : memref<1x18x18x128xf32, #tpu.memory_space<vmem>>, vector<1x18x1x128xf32>
    %59 = vector.shape_cast %58 : vector<1x18x1x128xf32> to vector<18x1x128xf32>
    %60 = vector.shape_cast %48 : vector<18x1x128xf32> to vector<1x18x1x128xf32>
    tpu.vector_store %arg4[%c0_38, %c0_39, %c17_40, %c0_41], %60 {strides = array<i32>} : memref<1x18x18x128xf32, #tpu.memory_space<vmem>>, vector<1x18x1x128xf32>,
    %61 = vector.shape_cast %15 : vector<256x128xf32> to vector<16x16x128xf32>
    %c0_42 = arith.constant 0 : index
    %c1_43 = arith.constant 1 : index
    %c1_44 = arith.constant 1 : index
    %c0_45 = arith.constant 0 : index
    %62 = vector.load %arg4[%c0_42, %c1_43, %c1_44, %c0_45] : memref<1x18x18x128xf32, #tpu.memory_space<vmem>>, vector<1x16x16x128xf32>
    %63 = vector.shape_cast %62 : vector<1x16x16x128xf32> to vector<16x16x128xf32>
    %64 = vector.shape_cast %61 : vector<16x16x128xf32> to vector<1x16x16x128xf32>
    tpu.vector_store %arg4[%c0_42, %c1_43, %c1_44, %c0_45], %64 {strides = array<i32>} : memref<1x18x18x128xf32, #tpu.memory_space<vmem>>, vector<1x16x16x128xf32>,
    return
  }
  func.func @transform_0(%arg0: i32) -> (i32, i32, i32, i32) {
    %c0_i32 = arith.constant 0 : i32
    %c0_i32_0 = arith.constant 0 : i32
    %c0_i32_1 = arith.constant 0 : i32
    %c0_i32_2 = arith.constant 0 : i32
    return %arg0, %c0_i32, %c0_i32_0, %c0_i32_1 : i32, i32, i32, i32
  }
  func.func @transform_1(%arg0: i32) -> (i32, i32) {
    %c0_i32 = arith.constant 0 : i32
    %c0_i32_0 = arith.constant 0 : i32
    %c0_i32_1 = arith.constant 0 : i32
    return %c0_i32, %c0_i32_0 : i32, i32
  }
  func.func @transform_2(%arg0: i32) -> (i32, i32) {
    %c0_i32 = arith.constant 0 : i32
    %c0_i32_0 = arith.constant 0 : i32
    %c0_i32_1 = arith.constant 0 : i32
    return %c0_i32, %c0_i32_0 : i32, i32
  }
  func.func @transform_3(%arg0: i32) -> (i32, i32, i32, i32) {
    %c0_i32 = arith.constant 0 : i32
    %c0_i32_0 = arith.constant 0 : i32
    %c0_i32_1 = arith.constant 0 : i32
    %c0_i32_2 = arith.constant 0 : i32
    return %arg0, %c0_i32, %c0_i32_0, %c0_i32_1 : i32, i32, i32, i32
  }
  func.func @transform_4(%arg0: i32) -> (i32, i32, i32, i32) {
    %c0_i32 = arith.constant 0 : i32
    %c0_i32_0 = arith.constant 0 : i32
    %c0_i32_1 = arith.constant 0 : i32
    %c0_i32_2 = arith.constant 0 : i32
    return %arg0, %c0_i32, %c0_i32_0, %c0_i32_1 : i32, i32, i32, i32
  }
  func.func @transform_5(%arg0: i32) -> (i32, i32, i32) {
    %c0_i32 = arith.constant 0 : i32
    %c0_i32_0 = arith.constant 0 : i32
    %c0_i32_1 = arith.constant 0 : i32
    return %arg0, %c0_i32, %c0_i32_0 : i32, i32, i32
  }
}

</mosaic_0001>

<bundles_post_ra>
// kernel: tpu_custom_call.1
= control target key start
LH: loop header
LB: loop body
LE: loop exit
PB: predicated region body
PF: predicated region fallthrough
CT: control target
= control target key end

     0   :  { %11 = vsyncpa [#allocation3], 0  ;;  %s4854_s0 = inlined_call_operand.vmem [shape: f32[2,18,18,128], index: 0, kind: input, shape index: {}]   ;;  %s4855_s1 = inlined_call_operand.vmem [shape: bf16[1152,128], index: 1, kind: input, shape index: {}]   ;;  %s4856_s2 = inlined_call_operand.vmem [shape: bf16[128,128], index: 2, kind: input, shape index: {}]   ;;  %s4857_s3 = inlined_call_operand.vmem [shape: f32[2,18,18,128], index: 3, kind: output, shape index: {0}]   ;;  %s4858_s4 = inlined_call_operand.hbm [shape: f32[2,16,16,128], index: 4, kind: output, shape index: {1}]   ;;  %s4859_s5 = inlined_call_operand.hbm [shape: f32[2,4,128], index: 5, kind: output, shape index: {2}]  }
   0x1   :  { %13 = vsyncpa [#allocation3 + $0x1], 0 }
   0x2   :  { %14 = vsyncpa [#allocation5], 0 }
   0x3   :  { %16 = vsyncpa [#allocation5 + $0x1], 0  ;;  %s3734_s18 = smov 0   ;;  %s3736_s19 = smov 0  }
   0x4   :  { %s3738_s20 = smov 0   ;;  %s3740_s21 = smov 0  }
   0x5 LB: > { %s3755_s22 = sadd.s32 4294967295, %s3697_s21   ;;  %s2752_s23 = sadd.s32 4294967294, %s3697_s21   ;;  %s3697_s21 = sphi %s3740_s21, %s4880_s21   ;;  %s3693_s20 = sphi %s3738_s20, %s4879_s20   ;;  %s3689_s19 = sphi %s3736_s19, %s4878_s19   ;;  %s3685_s18 = sphi %s3734_s18, %s4877_s18  }
   0x6   : > { %s3759_s24 = sadd.s32 1, %s3697_s21   ;;  %s123_s25 = sadd.s32 1, %s3693_s20 }
   0x7   : > { %s120_s26 = ssub.s32 %s3697_s21, %s3759_s24  ;;  %p133_p0 = scmp.ne.s32.totalorder %s3693_s20, %s3689_s19 }
   0x8   : > { %p121_p1 = scmp.eq.s32.totalorder %s120_s26, 0  ;;  %p134_p2 = scmp.eq.s32.totalorder %s3755_s22, 1 }
   0x9   : > { %p139_p3 = scmp.ne.s32.totalorder %s3689_s19, %s3685_s18  ;;  %p140_p4 = scmp.eq.s32.totalorder %s2752_s23, 1 }
   0xa   : > { %s3770_s27 = scalar_select %p121_p1, %s3693_s20, %s123_s25  }
   0xb   : > { %p3772_p5 = por %p134_p2, %p133_p0  ;;  %p3776_p6 = por %p140_p4, %p139_p3 }
   0xc   : > { %p2755_p7 = scmp.ge.s32.totalorder %s3697_s21, 1  ;;  %p198_p8 = scmp.lt.s32.totalorder %s3697_s21, 3 }
   0xe   : > { %p199_p9 = pnand %p2755_p7, %p198_p8 }
  0x10   : > { %202 = sbr.rel (%p199_p9) target bundleno = 634 (0x27a), region = 32 }
  0x17   : > { %v3523_v0 = vld [vmem:[%s4855_s1 + $0x40] sm:$0xff]   ;;  %v3527_v4 = vld [vmem:[%s4855_s1 + $0x48] sm:$0xff]   ;;  %v3531_v8 = vld [vmem:[%s4855_s1 + $0x50] sm:$0xff]   ;;  %p236_p10 = scmp.lt.s32.totalorder %s3755_s22, 1  ;;  %vm349_vm0 = vcmask 1046528   ;;  %vm462_vm1 = vcmask 1045504  }
  0x18   : > { %v3524_v1 = vld [vmem:[%s4855_s1 + $0xc0] sm:$0xff]   ;;  %2883 = vmatprep.subr.bf16.mxu0 %v3523_v0  ;;  %v3528_v5 = vld [vmem:[%s4855_s1 + $0xc8] sm:$0xff]   ;;  %v3532_v9 = vld [vmem:[%s4855_s1 + $0xd0] sm:$0xff]   ;;  %s2882_s30 = sshll.u32 %s3755_s22, 12  ;;  %s3700_s14 = smov [#allocation2]  }
  0x19   : > { %v3525_v2 = vld [vmem:[%s4855_s1] sm:$0xff]   ;;  %2995 = vmatprep.subr.bf16.mxu1 %v3524_v1  ;;  %v3529_v6 = vld [vmem:[%s4855_s1 + $0x8] sm:$0xff]   ;;  %v3533_v10 = vld [vmem:[%s4855_s1 + $0x10] sm:$0xff]   ;;  %s3850_s17 = scalar_select %p236_p10, %s3755_s22, 1 }
  0x1a   : > { %v3526_v3 = vld [vmem:[%s4855_s1 + $0x80] sm:$0xff]   ;;  %2884 = vmatpush3.bf16.msra.mxu0 %v3525_v2  ;;  %v3530_v7 = vld [vmem:[%s4855_s1 + $0x88] sm:$0xff]   ;;  %v3534_v11 = vld [vmem:[%s4855_s1 + $0x90] sm:$0xff]   ;;  %s4764_s11 = scalar_lea.hbm %s4858_s4, %s2882_s30  ;;  %s3607_s15 = sshll.u32 %s3700_s14, 4  ;;  %s3608_s15 = int_to_ptr.vmem [resolvable:$false] %s3607_s15 }
  0x1b   : > { %2996 = vmatpush3.bf16.msra.mxu1 %v3526_v3  ;;  %2885 = vmatprep.subr.bf16.mxu0 %v3527_v4  ;;  %v3535_v12 = vld [vmem:[%s4855_s1 + $0x58] sm:$0xff]   ;;  %v3539_v16 = vld [vmem:[%s4855_s1 + $0x60] sm:$0xff]   ;;  %v3543_v20 = vld [vmem:[%s4855_s1 + $0x68] sm:$0xff]   ;;  %s3475_s10 = smul.u32 432, %s3850_s17  ;;  %s4654_s17 = sand.u32 1, %s3689_s19  }
  0x1c   : > { %2997 = vmatprep.subr.bf16.mxu1 %v3528_v5  ;;  %v3536_v13 = vld [vmem:[%s4855_s1 + $0xd8] sm:$0xff]   ;;  %v3540_v17 = vld [vmem:[%s4855_s1 + $0xe0] sm:$0xff]   ;;  %v3544_v21 = vld [vmem:[%s4855_s1 + $0xe8] sm:$0xff]   ;;  %s2599_s12 = scalar_lea.sflag [#allocation3], %s4654_s17  ;;  %s3609_s16 = scalar_lea.vmem %s3608_s15, 8192 }
  0x1d   : > { %v3537_v14 = vld [vmem:[%s4855_s1 + $0x18] sm:$0xff]   ;;  %v3541_v18 = vld [vmem:[%s4855_s1 + $0x20] sm:$0xff]   ;;  %v3545_v22 = vld [vmem:[%s4855_s1 + $0x28] sm:$0xff]   ;;  %s3882_s6 = scalar_lea.vmem %s4854_s0, %s3475_s10  ;;  %s4577_s25 = scalar_lea.vmem %s4857_s3, %s3475_s10 }
  0x1e   : > { %2886 = vmatpush3.bf16.msra.mxu0 %v3529_v6  ;;  %v3538_v15 = vld [vmem:[%s4855_s1 + $0x98] sm:$0xff]   ;;  %v3542_v19 = vld [vmem:[%s4855_s1 + $0xa0] sm:$0xff]   ;;  %v3546_v23 = vld [vmem:[%s4855_s1 + $0xa8] sm:$0xff]   ;;  %s2756_s10 = sshll.u32 %s4654_s17, 8 }
  0x1f   : > { %2998 = vmatpush3.bf16.msra.mxu1 %v3530_v7  ;;  %2887 = vmatprep.subr.bf16.mxu0 %v3531_v8  ;;  %v3547_v24 = vld [vmem:[%s4855_s1 + $0x70] sm:$0xff]   ;;  %v3551_v28 = vld [vmem:[%s4855_s1 + $0x78] sm:$0xff]   ;;  %v247_v32 = vld [vmem:[%s3882_s6] sm:$0xff]  ;;  %s4666_s26 = scalar_lea.vmem [#allocation2], %s2756_s10 }
  0x20   : > { %2999 = vmatprep.subr.bf16.mxu1 %v3532_v9  ;;  %v3548_v25 = vld [vmem:[%s4855_s1 + $0xf0] sm:$0xff]   ;;  %v3552_v29 = vld [vmem:[%s4855_s1 + $0xf8] sm:$0xff]   ;;  %v248_v33 = vld [vmem:[%s3882_s6 + $0x8] sm:$0xff]  ;;  %v350_v35 = vrot.slane %v247_v32, 1  ;;  %v463_v50 = vrot.slane %v247_v32, 2  ;;  %s2620_s7 = sshll.u32 %s4666_s26, 4  ;;  %s4766_s7 = int_to_ptr.vmem [resolvable:$true] %s2620_s7 }
  0x21   : > { %v3549_v26 = vld [vmem:[%s4855_s1 + $0x30] sm:$0xff]   ;;  %v3553_v30 = vld [vmem:[%s4855_s1 + $0x38] sm:$0xff]   ;;  %v351_v36 = vrot.slane %v248_v33, 1  ;;  %v251_v39 = vld [vmem:[%s3882_s6 + $0x20] sm:$0xff]  ;;  %v609_v47 = vpack.c.bf16 %v248_v33, %v247_v32  ;;  %v464_v51 = vrot.slane %v248_v33, 2  ;;  %s3603_s13 = scalar_lea.vmem %s4766_s7, 4096  ;;  %p3610_p0 = scmp.lt.s32.totalorder %s4766_s7, %s3608_s15 }
  0x22   : > { %2888 = vmatpush3.bf16.msra.mxu0 %v3533_v10  ;;  %v3550_v27 = vld [vmem:[%s4855_s1 + $0xb0] sm:$0xff]   ;;  %v3554_v31 = vld [vmem:[%s4855_s1 + $0xb8] sm:$0xff]   ;;  %v356_v42 = vrot.slane %v251_v39, 1  ;;  %v3555_v48 = vld [vmem:[%s4855_s1 + $0x140] sm:$0xff]   ;;  %v469_v54 = vrot.slane %v251_v39, 2  ;;  %p3604_p11 = scmp.ne.s32.totalorder %s4766_s7, %s3603_s13  ;;  %p3611_p1 = scmp.lt.s32.totalorder %s3609_s16, %s3603_s13 }
  0x23   : > { %3000 = vmatpush3.bf16.msra.mxu1 %v3534_v11  ;;  %2889 = vmatprep.subr.bf16.mxu0 %v3535_v12  ;;  %v249_v34 = vld [vmem:[%s3882_s6 + $0x10] sm:$0x3]  ;;  %v250_v38 = vld [vmem:[%s3882_s6 + $0x18] sm:$0xff]  ;;  %v352_v44 = vsel %vm349_vm0, %v350_v35, %v351_v36  ;;  %v3556_v52 = vld [vmem:[%s4855_s1 + $0x100] sm:$0xff]   ;;  %v465_v55 = vsel %vm462_vm1, %v463_v50, %v464_v51 }
  0x24   : > { %3001 = vmatprep.subr.bf16.mxu1 %v3536_v13  ;;  %v353_v37 = vrot.slane %v249_v34, 1  ;;  %v466_v40 = vrot.slane %v249_v34, 2  ;;  %v355_v41 = vrot.slane %v250_v38, 1  ;;  %v468_v43 = vrot.slane %v250_v38, 2  ;;  %v3557_v53 = vld [vmem:[%s4855_s1 + $0x1c0] sm:$0xff]   ;;  %v253_v62 = vld [vmem:[%s3882_s6 + $0x30] sm:$0xff]  ;;  %p3605_p12 = pnand %p3604_p11, %p3772_p5  ;;  %p3612_p2 = por %p3611_p1, %p3610_p0 }
  0x25   : > { %v612_v46 = vpack.c.bf16 %v251_v39, %v250_v38  ;;  %v3558_v57 = vld [vmem:[%s4855_s1 + $0x180] sm:$0xff]   ;;  %v252_v58 = vld [vmem:[%s3882_s6 + $0x28] sm:$0x3]  ;;  %v254_v63 = vld [vmem:[%s3882_s6 + $0x38] sm:$0xff]  ;;  %v360_v2 = vrot.slane %v253_v62, 1 }
  0x26   : > { %2890 = vmatpush3.bf16.msra.mxu0 %v3537_v14  ;;  %v354_v45 = vsel %vm349_vm0, %v351_v36, %v353_v37  ;;  %v467_v56 = vsel %vm462_vm1, %v464_v51, %v466_v40  ;;  %v357_v60 = vsel %vm349_vm0, %v355_v41, %v356_v42  ;;  %v358_v61 = vrot.slane %v252_v58, 1  ;;  %v255_v1 = vld [vmem:[%s3882_s6 + $0x40] sm:$0x3]  ;;  %v3920_v7 = vld [vmem:[%s3882_s6 + $0x48] sm:$0xff]  ;;  %v261_v33 = vld [vmem:[%s3882_s6 + $0x70] sm:$0x3]  ;;  %p3606_p13 = pneg %p3605_p12 }
  0x27   : > { %3002 = vmatpush3.bf16.msra.mxu1 %v3538_v15  ;;  %2891 = vmatprep.subr.bf16.mxu0 %v3539_v16  ;;  %v610_v49 = vpack.c.bf16 %v354_v45, %v352_v44  ;;  %v611_v59 = vpack.c.bf16 %v467_v56, %v465_v55  ;;  %v471_v0 = vrot.slane %v252_v58, 2  ;;  %v361_v3 = vrot.slane %v254_v63, 1  ;;  %v3559_v8 = vld [vmem:[%s4855_s1 + $0x148] sm:$0xff]   ;;  %v257_v15 = vld [vmem:[%s3882_s6 + $0x50] sm:$0xff]  ;;  %v3569_v55 = vld [vmem:[%s4855_s1 + $0x1d8] sm:$0xff]  }
  0x28   : > { %3003 = vmatprep.subr.bf16.mxu1 %v3540_v17  ;;  %1432 = vmatprep.mubr.bf16.mxu1 %v612_v46  ;;  %v359_v4 = vsel %vm349_vm0, %v356_v42, %v358_v61  ;;  %v3917_v5 = vpack.c.bf16 %v254_v63, %v253_v62  ;;  %v363_v6 = vrot.slane %v255_v1, 1  ;;  %v470_v10 = vsel %vm462_vm1, %v468_v43, %v469_v54  ;;  %v3560_v13 = vld [vmem:[%s4855_s1 + $0x108] sm:$0xff]   ;;  %v3564_v36 = vld [vmem:[%s4855_s1 + $0x110] sm:$0xff]   ;;  %v262_v56 = vld [vmem:[%s3882_s6 + $0x78] sm:$0xff]  ;;  %p3613_p3 = pnand %p3612_p2, %p3606_p13 }
  0x29   : > { %1271 = vmatprep.mubr.bf16.mxu0 %v610_v49  ;;  %v3925_v9 = vpack.c.bf16 %v359_v4, %v357_v60  ;;  %v472_v11 = vsel %vm462_vm1, %v469_v54, %v471_v0  ;;  %v362_v12 = vsel %vm349_vm0, %v360_v2, %v361_v3  ;;  %v3561_v16 = vld [vmem:[%s4855_s1 + $0x1c8] sm:$0xff]   ;;  %v473_v17 = vrot.slane %v253_v62, 2  ;;  %v3565_v37 = vld [vmem:[%s4855_s1 + $0x1d0] sm:$0xff]   ;;  %v3570_v58 = vld [vmem:[%s4855_s1 + $0x198] sm:$0xff]  }
  0x2a   : > { %2892 = vmatpush3.bf16.msra.mxu0 %v3541_v18  ;;  %v364_v14 = vsel %vm349_vm0, %v361_v3, %v363_v6  ;;  %v260_v32 = vld [vmem:[%s3882_s6 + $0x68] sm:$0xff]  ;;  %v3566_v39 = vld [vmem:[%s4855_s1 + $0x190] sm:$0xff]   ;;  %v373_v43 = vrot.slane %v261_v33, 1  ;;  %v478_v44 = vrot.slane %v3920_v7, 2  ;;  %v479_v45 = vrot.slane %v257_v15, 2  ;;  %v3571_v4 = vld [vmem:[%s4855_s1 + $0x160] sm:$0xff]  }
  0x2b   : > { %3004 = vmatpush3.bf16.msra.mxu1 %v3542_v19  ;;  %2893 = vmatprep.subr.bf16.mxu0 %v3543_v20  ;;  %v3940_v18 = vpack.c.bf16 %v364_v14, %v362_v12  ;;  %v3562_v19 = vld [vmem:[%s4855_s1 + $0x188] sm:$0xff]   ;;  %v3945_v20 = vpack.c.bf16 %v472_v11, %v470_v10  ;;  %v371_v42 = vrot.slane %v260_v32, 1  ;;  %v375_v61 = vrot.slane %v262_v56, 1  ;;  %v3572_v6 = vld [vmem:[%s4855_s1 + $0x120] sm:$0xff]  }
  0x2c   : > { %3005 = vmatprep.subr.bf16.mxu1 %v3544_v21  ;;  %v365_v21 = vrot.slane %v3920_v7, 1  ;;  %v3987_v49 = vld [vmem:[%s3882_s6 + $0x88] sm:$0x3]  ;;  %v486_v3 = vrot.slane %v261_v33, 2  ;;  %v3573_v10 = vld [vmem:[%s4855_s1 + $0x1e0] sm:$0xff]  }
  0x2d   : > { %v374_v51 = vsel %vm349_vm0, %v371_v42, %v373_v43  ;;  %v3574_v14 = vld [vmem:[%s4855_s1 + $0x1a0] sm:$0xff]  }
  0x2e   : > { %2894 = vmatpush3.bf16.msra.mxu0 %v3545_v22  ;;  %v366_v22 = vrot.slane %v257_v15, 1 }
  0x2f   : > { %3006 = vmatpush3.bf16.msra.mxu1 %v3546_v23  ;;  %2895 = vmatprep.subr.bf16.mxu0 %v3547_v24  ;;  %v258_v23 = vld [vmem:[%s3882_s6 + $0x58] sm:$0x3]  ;;  %v474_v24 = vrot.slane %v254_v63, 2  ;;  %v378_v63 = vrot.slane %v3987_v49, 1 }
  0x30   : > { %3007 = vmatprep.subr.bf16.mxu1 %v3548_v25  ;;  %v3950_v25 = vpack.c.bf16 %v257_v15, %v3920_v7  ;;  %v265_v15 = vld [vmem:[%s3882_s6 + $0x90] sm:$0xff] }
  0x31   : > { %v475_v34 = vsel %vm462_vm1, %v473_v17, %v474_v24  ;;  %v488_v17 = vrot.slane %v262_v56, 2 }
  0x32   : > { %2896 = vmatpush3.bf16.msra.mxu0 %v3549_v26  ;;  %v476_v26 = vrot.slane %v255_v1, 2  ;;  %v484_v1 = vrot.slane %v260_v32, 2 }
  0x33   : > { %3008 = vmatpush3.bf16.msra.mxu1 %v3550_v27  ;;  %2897 = vmatprep.subr.bf16.mxu0 %v3551_v28  ;;  %v368_v27 = vrot.slane %v258_v23, 1  ;;  %v3563_v28 = vld [vmem:[%s4855_s1 + $0x150] sm:$0xff]  }
  0x34   : > { %3009 = vmatprep.subr.bf16.mxu1 %v3552_v29  ;;  %v367_v29 = vsel %vm349_vm0, %v365_v21, %v366_v22  ;;  %v477_v35 = vsel %vm462_vm1, %v474_v24, %v476_v26  ;;  %v487_v12 = vsel %vm462_vm1, %v484_v1, %v486_v3  ;;  %v3575_v26 = vld [vmem:[%s4855_s1 + $0x168] sm:$0xff]  }
  0x35   : > { %v3976_v40 = vpack.c.bf16 %v477_v35, %v475_v34  ;;  %v3578_v34 = vld [vmem:[%s4855_s1 + $0x1a8] sm:$0xff]  }
  0x36   : > { %2898 = vmatpush3.bf16.msra.mxu0 %v3553_v30  ;;  %v369_v30 = vsel %vm349_vm0, %v366_v22, %v368_v27  ;;  %v380_v22 = vrot.slane %v265_v15, 1  ;;  %v272_v3 = vld [vmem:[%s3882_s6 + $0xc8] sm:$0xff] }
  0x37   : > { %3010 = vmatpush3.bf16.msra.mxu1 %v3554_v31  ;;  %3107 = vmatprep.subr.bf16.mxu0 %v3555_v48  ;;  %v259_v31 = vld [vmem:[%s3882_s6 + $0x60] sm:$0xff]  ;;  %v3971_v38 = vpack.c.bf16 %v369_v30, %v367_v29  ;;  %v3567_v48 = vld [vmem:[%s4855_s1 + $0x158] sm:$0xff]   ;;  %v491_v29 = vrot.slane %v3987_v49, 2  ;;  %v3576_v30 = vld [vmem:[%s4855_s1 + $0x128] sm:$0xff]  }
  0x38   : > { %3219 = vmatprep.subr.bf16.mxu1 %v3557_v53  ;;  %v370_v41 = vrot.slane %v259_v31, 1  ;;  %v480_v53 = vsel %vm462_vm1, %v478_v44, %v479_v45  ;;  %v483_v0 = vrot.slane %v259_v31, 2 }
  0x39   : > { %1272 = vmatmul.mubr.bf16.vlgmr.msra.gmra.mrb[0].mxu0 %v609_v47  ;;  %v481_v47 = vrot.slane %v258_v23, 2 }
  0x3a   : > { %3108 = vmatpush3.bf16.msra.mxu0 %v3556_v52  ;;  %1433 = vmatmul.mubr.bf16.vlgmr.msra.gmra.mrb[0].mxu1 %v611_v59  ;;  %v372_v50 = vsel %vm349_vm0, %v370_v41, %v371_v42  ;;  %v3568_v52 = vld [vmem:[%s4855_s1 + $0x118] sm:$0xff]   ;;  %v485_v11 = vsel %vm462_vm1, %v483_v0, %v484_v1  ;;  %v269_v41 = vld [vmem:[%s3882_s6 + $0xb0] sm:$0xff]  ;;  %v493_v42 = vrot.slane %v265_v15, 2 }
  0x3b   : > { %3220 = vmatpush3.bf16.msra.mxu1 %v3558_v57  ;;  %1440 = vmatprep.mubr.bf16.mxu1 %v3917_v5  ;;  %v482_v54 = vsel %vm462_vm1, %v479_v45, %v481_v47  ;;  %v263_v57 = vld [vmem:[%s3882_s6 + $0x80] sm:$0xff]  ;;  %v4006_v59 = vpack.c.bf16 %v374_v51, %v372_v50  ;;  %v4038_v21 = vpack.c.bf16 %v487_v12, %v485_v11  ;;  %v3579_v47 = vld [vmem:[%s4855_s1 + $0x170] sm:$0xff]   ;;  %v386_v49 = vrot.slane %v269_v41, 1  ;;  %v3584_v12 = vld [vmem:[%s4855_s1 + $0x138] sm:$0xff]  }
  0x3c   : > { %3109 = vmatprep.subr.bf16.mxu0 %v3559_v8  ;;  %1279 = vmatprep.mubr.bf16.mxu0 %v3925_v9  ;;  %v4008_v60 = vpack.c.bf16 %v482_v54, %v480_v53  ;;  %v376_v62 = vrot.slane %v263_v57, 1  ;;  %v4011_v2 = vpack.c.bf16 %v263_v57, %v262_v56  ;;  %v489_v27 = vrot.slane %v263_v57, 2  ;;  %v3580_v53 = vld [vmem:[%s4855_s1 + $0x130] sm:$0xff]  }
  0x3d   : > { %3221 = vmatprep.subr.bf16.mxu1 %v3561_v16  ;;  %v266_v16 = vld [vmem:[%s3882_s6 + $0x98] sm:$0xff]  ;;  %v3581_v54 = vld [vmem:[%s4855_s1 + $0x1f0] sm:$0xff]   ;;  %v499_v1 = vrot.slane %v269_v41, 2 }
  0x3e   : > { %3110 = vmatpush3.bf16.msra.mxu0 %v3560_v13  ;;  %v377_v7 = vsel %vm349_vm0, %v375_v61, %v376_v62  ;;  %v379_v8 = vsel %vm349_vm0, %v376_v62, %v378_v63  ;;  %v267_v13 = vld [vmem:[%s3882_s6 + $0xa0] sm:$0x3]  ;;  %v381_v23 = vrot.slane %v266_v16, 1  ;;  %v490_v35 = vsel %vm462_vm1, %v488_v17, %v489_v27  ;;  %v273_v63 = vld [vmem:[%s3882_s6 + $0xd0] sm:$0x3]  ;;  %v274_v17 = vld [vmem:[%s3882_s6 + $0xd8] sm:$0xff] }
  0x3f   : > { %3222 = vmatpush3.bf16.msra.mxu1 %v3562_v19  ;;  %3111 = vmatprep.subr.bf16.mxu0 %v3563_v28  ;;  %v4036_v19 = vpack.c.bf16 %v379_v8, %v377_v7  ;;  %v383_v24 = vrot.slane %v267_v13, 1  ;;  %v4043_v28 = vpack.c.bf16 %v266_v16, %v265_v15  ;;  %v494_v43 = vrot.slane %v266_v16, 2  ;;  %v271_v62 = vld [vmem:[%s3882_s6 + $0xc0] sm:$0xff]  ;;  %v3585_v15 = vld [vmem:[%s4855_s1 + $0x1f8] sm:$0xff]  }
  0x40   : > { %3223 = vmatprep.subr.bf16.mxu1 %v3565_v37  ;;  %v4064_v37 = vld [vmem:[%s3882_s6 + $0xb8] sm:$0x3]  ;;  %v390_v7 = vrot.slane %v271_v62, 1  ;;  %v391_v8 = vrot.slane %v272_v3, 1  ;;  %v393_v11 = vrot.slane %v273_v63, 1 }
  0x41   : > { %1280 = vmatmul.mubr.bf16.gmra.mrb[4].mxu0 %v612_v46  ;;  %v3979_v46 = vpack.c.bf16 %v260_v32, %v259_v31  ;;  %v3577_v31 = vld [vmem:[%s4855_s1 + $0x1e8] sm:$0xff]   ;;  %v382_v32 = vsel %vm349_vm0, %v380_v22, %v381_v23  ;;  %v384_v33 = vsel %vm349_vm0, %v381_v23, %v383_v24  ;;  %v388_v50 = vrot.slane %v4064_v37, 1  ;;  %v3586_v16 = vld [vmem:[%s4855_s1 + $0x1b8] sm:$0xff]  }
  0x42   : > { %1287 = vmatprep.mubr.bf16.mxu0 %v3940_v18  ;;  %1441 = vmatmul.mubr.bf16.gmra.mrb[4].mxu1 %v3945_v20  ;;  %v4068_v44 = vpack.c.bf16 %v384_v33, %v382_v32  ;;  %v276_v22 = vld [vmem:[%s3882_s6 + $0xe8] sm:$0x3]  ;;  %v503_v23 = vrot.slane %v271_v62, 2  ;;  %v504_v24 = vrot.slane %v272_v3, 2  ;;  %v275_v33 = vld [vmem:[%s3882_s6 + $0xe0] sm:$0xff] }
  0x43   : > { %1448 = vmatprep.mubr.bf16.mxu1 %v3950_v25  ;;  %3112 = vmatpush3.bf16.msra.mxu0 %v3564_v36  ;;  %v492_v36 = vsel %vm462_vm1, %v489_v27, %v491_v29  ;;  %v389_v57 = vsel %vm349_vm0, %v386_v49, %v388_v50  ;;  %v394_v27 = vsel %vm349_vm0, %v391_v8, %v393_v11  ;;  %v4127_v29 = vld [vmem:[%s4855_s1 + $0x200] sm:$0xff]   ;;  %v280_v11 = vld [vmem:[%s3882_s6 + $0x108] sm:$0xff] }
  0x44   : > { %3224 = vmatpush3.bf16.msra.mxu1 %v3566_v39  ;;  %3113 = vmatprep.subr.bf16.mxu0 %v3567_v48  ;;  %v268_v39 = vld [vmem:[%s3882_s6 + $0xa8] sm:$0xff]  ;;  %v4073_v48 = vpack.c.bf16 %v492_v36, %v490_v35  ;;  %v396_v36 = vrot.slane %v275_v33, 1 }
  0x45   : > { %3225 = vmatprep.subr.bf16.mxu1 %v3569_v55  ;;  %v385_v45 = vrot.slane %v268_v39, 1  ;;  %v4076_v51 = vpack.c.bf16 %v269_v41, %v268_v39  ;;  %v3582_v55 = vld [vmem:[%s4855_s1 + $0x1b0] sm:$0xff]   ;;  %v498_v0 = vrot.slane %v268_v39, 2  ;;  %v279_v41 = vld [vmem:[%s3882_s6 + $0x100] sm:$0x3] }
  0x47   : > { %3114 = vmatpush3.bf16.msra.mxu0 %v3568_v52  ;;  %v496_v52 = vrot.slane %v267_v13, 2  ;;  %v387_v56 = vsel %vm349_vm0, %v385_v45, %v386_v49  ;;  %v4108_v13 = vpack.c.bf16 %v272_v3, %v271_v62  ;;  %v277_v45 = vld [vmem:[%s3882_s6 + $0xf0] sm:$0xff]  ;;  %v509_v62 = vrot.slane %v275_v33, 2 }
  0x48   : > { %3226 = vmatpush3.bf16.msra.mxu1 %v3570_v58  ;;  %3115 = vmatprep.subr.bf16.mxu0 %v3571_v4  ;;  %v495_v58 = vsel %vm462_vm1, %v493_v42, %v494_v43  ;;  %v3583_v4 = vld [vmem:[%s4855_s1 + $0x178] sm:$0xff]   ;;  %v4145_v42 = vpack.c.bf16 %v275_v33, %v274_v17  ;;  %v400_v49 = vrot.slane %v277_v45, 1 }
  0x49   : > { %1288 = vmatmul.mubr.bf16.gmra.mrb[8].mxu0 %v3917_v5  ;;  %3227 = vmatprep.subr.bf16.mxu1 %v3573_v10  ;;  %v497_v61 = vsel %vm462_vm1, %v494_v43, %v496_v52  ;;  %v506_v43 = vrot.slane %v273_v63, 2  ;;  %v403_v52 = vrot.slane %v279_v41, 1 }
  0x4a   : > { %1295 = vmatprep.mubr.bf16.mxu0 %v3971_v38  ;;  %1449 = vmatmul.mubr.bf16.gmra.mrb[8].mxu1 %v3976_v40  ;;  %v4103_v10 = vpack.c.bf16 %v497_v61, %v495_v58  ;;  %v508_v61 = vrot.slane %v274_v17, 2 }
  0x4b   : > { %1456 = vmatprep.mubr.bf16.mxu1 %v3979_v46  ;;  %3116 = vmatpush3.bf16.msra.mxu0 %v3572_v6  ;;  %v4101_v6 = vpack.c.bf16 %v389_v57, %v387_v56  ;;  %v507_v56 = vsel %vm462_vm1, %v504_v24, %v506_v43  ;;  %v284_v43 = vld [vmem:[%s3882_s6 + $0x128] sm:$0xff] }
  0x4c   : > { %3228 = vmatpush3.bf16.msra.mxu1 %v3574_v14  ;;  %3117 = vmatprep.subr.bf16.mxu0 %v3575_v26  ;;  %v501_v14 = vrot.slane %v4064_v37, 2  ;;  %v392_v26 = vsel %vm349_vm0, %v390_v7, %v391_v8  ;;  %v398_v37 = vrot.slane %v276_v22, 1  ;;  %v282_v8 = vld [vmem:[%s3882_s6 + $0x118] sm:$0x3] }
  0x4d   : > { %3229 = vmatprep.subr.bf16.mxu1 %v3577_v31  ;;  %v500_v31 = vsel %vm462_vm1, %v498_v0, %v499_v1  ;;  %v4140_v35 = vpack.c.bf16 %v394_v27, %v392_v26  ;;  %v511_v0 = vrot.slane %v276_v22, 2  ;;  %v408_v22 = vrot.slane %v282_v8, 1 }
  0x4e   : > { %v502_v32 = vsel %vm462_vm1, %v499_v1, %v501_v14  ;;  %v516_v27 = vrot.slane %v279_v41, 2 }
  0x4f   : > { %3118 = vmatpush3.bf16.msra.mxu0 %v3576_v30  ;;  %v4132_v30 = vld [vmem:[%s4856_s2] sm:$0xff]   ;;  %v4142_v39 = vpack.c.bf16 %v502_v32, %v500_v31  ;;  %v512_v7 = vsel %vm462_vm1, %v509_v62, %v511_v0 }
  0x50   : > { %3230 = vmatpush3.bf16.msra.mxu1 %v3578_v34  ;;  %3119 = vmatprep.subr.bf16.mxu0 %v3579_v47  ;;  %v395_v34 = vrot.slane %v274_v17, 1  ;;  %v278_v47 = vld [vmem:[%s3882_s6 + $0xf8] sm:$0xff] }
  0x51   : > { %1296 = vmatmul.mubr.bf16.gmra.mrb[12].mxu0 %v3950_v25  ;;  %3231 = vmatprep.subr.bf16.mxu1 %v3581_v54  ;;  %v401_v50 = vrot.slane %v278_v47, 1  ;;  %v399_v54 = vsel %vm349_vm0, %v396_v36, %v398_v37  ;;  %v4161_v63 = vpack.c.bf16 %v278_v47, %v277_v45  ;;  %v283_v37 = vld [vmem:[%s3882_s6 + $0x120] sm:$0xff] }
  0x52   : > { %1303 = vmatprep.mubr.bf16.mxu0 %v4006_v59  ;;  %1457 = vmatmul.mubr.bf16.gmra.mrb[12].mxu1 %v4008_v60 }
  0x53   : > { %1464 = vmatprep.mubr.bf16.mxu1 %v4011_v2  ;;  %3120 = vmatpush3.bf16.msra.mxu0 %v3580_v53  ;;  %v397_v53 = vsel %vm349_vm0, %v395_v34, %v396_v36  ;;  %v402_v1 = vsel %vm349_vm0, %v400_v49, %v401_v50  ;;  %v404_v3 = vsel %vm349_vm0, %v401_v50, %v403_v52  ;;  %v285_v36 = vld [vmem:[%s3882_s6 + $0x130] sm:$0x3]  ;;  %v411_v49 = vrot.slane %v284_v43, 1 }
  0x54   : > { %3232 = vmatpush3.bf16.msra.mxu1 %v3582_v55  ;;  %3121 = vmatprep.subr.bf16.mxu0 %v3583_v4  ;;  %v505_v55 = vsel %vm462_vm1, %v503_v23, %v504_v24  ;;  %v4157_v57 = vpack.c.bf16 %v399_v54, %v397_v53  ;;  %v510_v4 = vsel %vm462_vm1, %v508_v61, %v509_v62  ;;  %v513_v23 = vrot.slane %v277_v45, 2 }
  0x55   : > { %3233 = vmatprep.subr.bf16.mxu1 %v3585_v15  ;;  %v4159_v58 = vpack.c.bf16 %v507_v56, %v505_v55  ;;  %v4174_v14 = vpack.c.bf16 %v404_v3, %v402_v1  ;;  %v4176_v15 = vpack.c.bf16 %v512_v7, %v510_v4  ;;  %v514_v24 = vrot.slane %v278_v47, 2  ;;  %v288_v1 = vld [vmem:[%s3882_s6 + $0x148] sm:$0x3]  ;;  %v286_v3 = vld [vmem:[%s3882_s6 + $0x138] sm:$0xff]  ;;  %v287_v4 = vld [vmem:[%s3882_s6 + $0x140] sm:$0xff] }
  0x56   : > { %v410_v47 = vrot.slane %v283_v37, 1  ;;  %v413_v50 = vrot.slane %v285_v36, 1  ;;  %v518_v52 = vrot.slane %v280_v11, 2  ;;  %v4195_v54 = vpack.c.bf16 %v284_v43, %v283_v37 }
  0x57   : > { %3122 = vmatpush3.bf16.msra.mxu0 %v3584_v12  ;;  %v281_v12 = vld [vmem:[%s3882_s6 + $0x110] sm:$0xff]  ;;  %v515_v33 = vsel %vm462_vm1, %v513_v23, %v514_v24  ;;  %v517_v34 = vsel %vm462_vm1, %v514_v24, %v516_v27  ;;  %v521_v55 = vrot.slane %v282_v8, 2  ;;  %v4212_v23 = vpack.c.bf16 %v287_v4, %v286_v3 }
  0x58   : > { %3234 = vmatpush3.bf16.msra.mxu1 %v3586_v16  ;;  %3379 = vmatprep.subr.bf16.mxu0 %v4127_v29  ;;  %v405_v16 = vrot.slane %v280_v11, 1  ;;  %v406_v17 = vrot.slane %v281_v12, 1  ;;  %v4178_v26 = vpack.c.bf16 %v281_v12, %v280_v11  ;;  %v4193_v45 = vpack.c.bf16 %v517_v34, %v515_v33  ;;  %v291_v34 = vld [vmem:[%s3882_s6 + $0x160] sm:$0x3] }
  0x59   : > { %1304 = vmatmul.mubr.bf16.gmra.mrb[16].mxu0 %v3979_v46  ;;  %3427 = vmatprep.subr.bf16.mxu1 %v4132_v30  ;;  %v519_v53 = vrot.slane %v281_v12, 2  ;;  %v412_v56 = vsel %vm349_vm0, %v410_v47, %v411_v49  ;;  %v414_v61 = vsel %vm349_vm0, %v411_v49, %v413_v50  ;;  %v415_v11 = vrot.slane %v286_v3, 1  ;;  %4869 = vst [vmem:[#allocation8_spill] sm:$0xff] %v4212_v23 }
  0x5a   : > { %1311 = vmatprep.mubr.bf16.mxu0 %v4036_v19  ;;  %1465 = vmatmul.mubr.bf16.gmra.mrb[16].mxu1 %v4038_v21  ;;  %v407_v31 = vsel %vm349_vm0, %v405_v16, %v406_v17  ;;  %v409_v32 = vsel %vm349_vm0, %v406_v17, %v408_v22  ;;  %v4208_v7 = vpack.c.bf16 %v414_v61, %v412_v56  ;;  %v416_v12 = vrot.slane %v287_v4, 1 }
  0x5b   : > { %1472 = vmatprep.mubr.bf16.mxu1 %v4043_v28  ;;  %v4191_v41 = vpack.c.bf16 %v409_v32, %v407_v31  ;;  %v520_v62 = vsel %vm462_vm1, %v518_v52, %v519_v53  ;;  %v522_v0 = vsel %vm462_vm1, %v519_v53, %v521_v55  ;;  %v418_v16 = vrot.slane %v288_v1, 1 }
  0x5c   : > { %v4210_v8 = vpack.c.bf16 %v522_v0, %v520_v62  ;;  %v523_v17 = vrot.slane %v283_v37, 2  ;;  %v524_v22 = vrot.slane %v284_v43, 2  ;;  %v526_v24 = vrot.slane %v285_v36, 2  ;;  %v289_v37 = vld [vmem:[%s3882_s6 + $0x150] sm:$0xff]  ;;  %v290_v43 = vld [vmem:[%s3882_s6 + $0x158] sm:$0xff] }
  0x5d   : > { %v417_v27 = vsel %vm349_vm0, %v415_v11, %v416_v12  ;;  %v419_v31 = vsel %vm349_vm0, %v416_v12, %v418_v16  ;;  %v420_v49 = vrot.slane %v289_v37, 1  ;;  %v421_v50 = vrot.slane %v290_v43, 1  ;;  %v293_v12 = vld [vmem:[%s3882_s6 + $0x170] sm:$0xff] }
  0x5e   : > { %v525_v32 = vsel %vm462_vm1, %v523_v17, %v524_v22  ;;  %v527_v33 = vsel %vm462_vm1, %v524_v22, %v526_v24  ;;  %v4225_v36 = vpack.c.bf16 %v419_v31, %v417_v27  ;;  %v423_v52 = vrot.slane %v291_v34, 1 }
  0x5f   : > { %v4227_v47 = vpack.c.bf16 %v527_v33, %v525_v32  ;;  %v528_v53 = vrot.slane %v286_v3, 2  ;;  %v529_v55 = vrot.slane %v287_v4, 2  ;;  %v4229_v56 = vpack.c.bf16 %v290_v43, %v289_v37  ;;  %v294_v4 = vld [vmem:[%s3882_s6 + $0x178] sm:$0x3] }
  0x60   : > { %4870 = vst [vmem:[#allocation9_spill] sm:$0xff] %v4225_v36  ;;  %v531_v61 = vrot.slane %v288_v1, 2  ;;  %v422_v62 = vsel %vm349_vm0, %v420_v49, %v421_v50  ;;  %v424_v0 = vsel %vm349_vm0, %v421_v50, %v423_v52  ;;  %v292_v1 = vld [vmem:[%s3882_s6 + $0x168] sm:$0xff]  ;;  %v426_v24 = vrot.slane %v293_v12, 1  ;;  %v295_v50 = vld [vmem:[%s3882_s6 + $0x180] sm:$0xff] }
  0x61   : > { %1312 = vmatmul.mubr.bf16.gmra.mrb[20].mxu0 %v4011_v2  ;;  %v530_v11 = vsel %vm462_vm1, %v528_v53, %v529_v55  ;;  %v4242_v16 = vpack.c.bf16 %v424_v0, %v422_v62  ;;  %v425_v22 = vrot.slane %v292_v1, 1  ;;  %v428_v27 = vrot.slane %v294_v4, 1  ;;  %v296_v52 = vld [vmem:[%s3882_s6 + $0x188] sm:$0xff] }
  0x62   : > { %1319 = vmatprep.mubr.bf16.mxu0 %v4068_v44  ;;  %1473 = vmatmul.mubr.bf16.gmra.mrb[20].mxu1 %v4073_v48  ;;  %v532_v3 = vsel %vm462_vm1, %v529_v55, %v531_v61  ;;  %v533_v31 = vrot.slane %v289_v37, 2  ;;  %v534_v32 = vrot.slane %v290_v43, 2  ;;  %v4246_v33 = vpack.c.bf16 %v293_v12, %v292_v1  ;;  %v297_v43 = vld [vmem:[%s3882_s6 + $0x190] sm:$0x3] }
  0x63   : > { %1480 = vmatprep.mubr.bf16.mxu1 %v4076_v51  ;;  %4871 = vst [vmem:[#allocation10_spill] sm:$0xff] %v4242_v16  ;;  %v4244_v17 = vpack.c.bf16 %v532_v3, %v530_v11  ;;  %v536_v49 = vrot.slane %v291_v34, 2  ;;  %v427_v53 = vsel %vm349_vm0, %v425_v22, %v426_v24  ;;  %v429_v55 = vsel %vm349_vm0, %v426_v24, %v428_v27 }
  0x64   : > { %v578_v61 = vrot.slane %v295_v50, 1  ;;  %v579_v62 = vrot.slane %v296_v52, 1  ;;  %v535_v37 = vsel %vm462_vm1, %v533_v31, %v534_v32  ;;  %v581_v0 = vrot.slane %v297_v43, 1 }
  0x65   : > { %4872 = vst [vmem:[#allocation11_spill] sm:$0xff] %v4244_v17  ;;  %v537_v34 = vsel %vm462_vm1, %v534_v32, %v536_v49  ;;  %v4259_v11 = vpack.c.bf16 %v429_v55, %v427_v53  ;;  %v538_v3 = vrot.slane %v292_v1, 2  ;;  %v539_v24 = vrot.slane %v293_v12, 2 }
  0x66   : > { %v582_v22 = vsel %vm349_vm0, %v579_v62, %v581_v0  ;;  %v4265_v27 = vpack.c.bf16 %v296_v52, %v295_v50  ;;  %v585_v31 = vrot.slane %v295_v50, 2  ;;  %v586_v1 = vrot.slane %v296_v52, 2  ;;  %v3590_v50 = vld [vmem:[%s4856_s2 + $0x8] sm:$0xff]   ;;  %v3592_v52 = vld [vmem:[%s4856_s2 + $0x10] sm:$0xff]  }
  0x67   : > { %v540_v32 = vsel %vm462_vm1, %v538_v3, %v539_v24  ;;  %v588_v12 = vrot.slane %v297_v43, 2  ;;  %v3601_v43 = vld [vmem:[%s4855_s1 + $0x238] sm:$0xff]   ;;  %v4364_v0 = vld [vmem:[%s3882_s6 + $0x1a8] sm:$0x3] }
  0x69   : > { %1320 = vmatmul.mubr.bf16.gmra.mrb[24].mxu0 %v4043_v28 }
  0x6a   : > { %1327 = vmatprep.mubr.bf16.mxu0 %v4101_v6  ;;  %1481 = vmatmul.mubr.bf16.gmra.mrb[24].mxu1 %v4103_v10 }
  0x6b   : > { %1488 = vmatprep.mubr.bf16.mxu1 %v4108_v13 }
  0x71   : > { %1328 = vmatmul.mubr.bf16.gmra.mrb[28].mxu0 %v4076_v51 }
  0x72   : > { %1335 = vmatprep.mubr.bf16.mxu0 %v4140_v35  ;;  %1489 = vmatmul.mubr.bf16.gmra.mrb[28].mxu1 %v4142_v39 }
  0x73   : > { %1496 = vmatprep.mubr.bf16.mxu1 %v4145_v42 }
  0x79   : > { %1336 = vmatmul.mubr.bf16.gmra.mrb[32].mxu0 %v4108_v13 }
  0x7a   : > { %1343 = vmatprep.mubr.bf16.mxu0 %v4157_v57  ;;  %1497 = vmatmul.mubr.bf16.gmra.mrb[32].mxu1 %v4159_v58 }
  0x7b   : > { %1504 = vmatprep.mubr.bf16.mxu1 %v4161_v63 }
  0x81   : > { %1344 = vmatmul.mubr.bf16.gmra.mrb[36].mxu0 %v4145_v42 }
  0x82   : > { %1351 = vmatprep.mubr.bf16.mxu0 %v4174_v14  ;;  %1505 = vmatmul.mubr.bf16.gmra.mrb[36].mxu1 %v4176_v15 }
  0x83   : > { %1512 = vmatprep.mubr.bf16.mxu1 %v4178_v26 }
  0x89   : > { %1352 = vmatmul.mubr.bf16.gmra.mrb[40].mxu0 %v4161_v63 }
  0x8a   : > { %1359 = vmatprep.mubr.bf16.mxu0 %v4191_v41  ;;  %1513 = vmatmul.mubr.bf16.gmra.mrb[40].mxu1 %v4193_v45 }
  0x8b   : > { %1520 = vmatprep.mubr.bf16.mxu1 %v4195_v54 }
  0x91   : > { %1360 = vmatmul.mubr.bf16.gmra.mrb[44].mxu0 %v4178_v26 }
  0x92   : > { %1367 = vmatprep.mubr.bf16.mxu0 %v4208_v7  ;;  %1521 = vmatmul.mubr.bf16.gmra.mrb[44].mxu1 %v4210_v8 }
  0x93   : > { %1528 = vmatprep.mubr.bf16.mxu1 %v4212_v23 }
  0x99   : > { %1368 = vmatmul.mubr.bf16.gmra.mrb[48].mxu0 %v4195_v54 }
  0x9a   : > { %1375 = vmatprep.mubr.bf16.mxu0 %v4225_v36  ;;  %1529 = vmatmul.mubr.bf16.gmra.mrb[48].mxu1 %v4227_v47 }
  0x9b   : > { %1536 = vmatprep.mubr.bf16.mxu1 %v4229_v56 }
  0xa1   : > { %1376 = vmatmul.mubr.bf16.gmra.mrb[52].mxu0 %v4212_v23  ;;  %v580_v23 = vsel %vm349_vm0, %v578_v61, %v579_v62  ;;  %v3596_v61 = vld [vmem:[%s4856_s2 + $0x20] sm:$0xff]   ;;  %v3597_v62 = vld [vmem:[%s4855_s1 + $0x228] sm:$0xff]  }
  0xa2   : > { %1383 = vmatprep.mubr.bf16.mxu0 %v4242_v16  ;;  %1537 = vmatmul.mubr.bf16.gmra.mrb[52].mxu1 %v4244_v17  ;;  %v4261_v16 = vpack.c.bf16 %v537_v34, %v535_v37  ;;  %v541_v17 = vrot.slane %v294_v4, 2  ;;  %v4267_v36 = vpack.c.bf16 %v582_v22, %v580_v23  ;;  %v587_v23 = vsel %vm462_vm1, %v585_v31, %v586_v1  ;;  %v3599_v37 = vld [vmem:[%s4855_s1 + $0x230] sm:$0xff]  }
  0xa3   : > { %1544 = vmatprep.mubr.bf16.mxu1 %v4246_v33  ;;  %v589_v4 = vsel %vm462_vm1, %v586_v1, %v588_v12  ;;  %v3600_v34 = vld [vmem:[%s4856_s2 + $0x30] sm:$0xff]   ;;  %v605_v22 = vrot.slane %v4364_v0, 2 }
  0xa4   : > { %v542_v49 = vsel %vm462_vm1, %v539_v24, %v541_v17  ;;  %v4279_v55 = vpack.c.bf16 %v589_v4, %v587_v23  ;;  %v3589_v17 = vld [vmem:[%s4855_s1 + $0x208] sm:$0xff]   ;;  %v4873_v1 = vld [vmem:[#allocation9_spill] sm:$0xff] }
  0xa5   : > { %v4275_v53 = vpack.c.bf16 %v542_v49, %v540_v32 }
  0xa9   : > { %1384 = vmatmul.mubr.bf16.gmra.mrb[56].mxu0 %v4229_v56 }
  0xaa   : > { %1391 = vmatprep.mubr.bf16.mxu0 %v4259_v11  ;;  %1545 = vmatmul.mubr.bf16.gmra.mrb[56].mxu1 %v4261_v16 }
  0xab   : > { %1552 = vmatprep.mubr.bf16.mxu1 %v4265_v27 }
  0xb1   : > { %1392 = vmatmul.mubr.bf16.gmra.mrb[60].mxu0 %v4246_v33 }
  0xb2   : > { %1593 = vmatprep.mubr.bf16.mxu0 %v3945_v20  ;;  %1553 = vmatmul.mubr.bf16.gmra.mrb[60].mxu1 %v4275_v53  ;;  %v3591_v20 = vld [vmem:[%s4855_s1 + $0x210] sm:$0xff]  }
  0xb3   : > { %1754 = vmatprep.mubr.bf16.mxu1 %v3940_v18 }
  0xb9   : > { %1594 = vmatmul.mubr.bf16.vlgmr.msra.gmra.mrb[64].mxu0 %v3925_v9 }
  0xba   : > { %3380 = vmatpush3.bf16.msra.mxu0 %v4127_v29  ;;  %1601 = vmatprep.mubr.bf16.mxu0 %v3976_v40  ;;  %v3594_v29 = vld [vmem:[%s4856_s2 + $0x18] sm:$0xff]  }
  0xbb   : > { %1755 = vmatmul.mubr.bf16.vlgmr.msra.gmra.mrb[64].mxu1 %v3917_v5  ;;  %3381 = vmatprep.subr.bf16.mxu0 %v3589_v17  ;;  %v3593_v5 = vld [vmem:[%s4855_s1 + $0x218] sm:$0xff]  }
  0xbc   : > { %3428 = vmatpush3.bf16.msra.mxu1 %v4132_v30  ;;  %1762 = vmatprep.mubr.bf16.mxu1 %v3971_v38  ;;  %v3595_v30 = vld [vmem:[%s4855_s1 + $0x220] sm:$0xff]  }
  0xbd   : > { %3429 = vmatprep.subr.bf16.mxu1 %v3590_v50 }
  0xbe   : > { %3382 = vmatpush3.bf16.msra.mxu0 %v3589_v17 }
  0xbf   : > { %3383 = vmatprep.subr.bf16.mxu0 %v3591_v20 }
  0xc0   : > { %3430 = vmatpush3.bf16.msra.mxu1 %v3590_v50 }
  0xc1   : > { %1602 = vmatmul.mubr.bf16.gmra.mrb[68].mxu0 %v3940_v18  ;;  %3431 = vmatprep.subr.bf16.mxu1 %v3592_v52 }
  0xc2   : > { %1609 = vmatprep.mubr.bf16.mxu0 %v4008_v60  ;;  %3384 = vmatpush3.bf16.msra.mxu0 %v3591_v20 }
  0xc3   : > { %1763 = vmatmul.mubr.bf16.gmra.mrb[68].mxu1 %v3950_v25  ;;  %3385 = vmatprep.subr.bf16.mxu0 %v3593_v5  ;;  %v3598_v25 = vld [vmem:[%s4856_s2 + $0x28] sm:$0xff]  }
  0xc4   : > { %1770 = vmatprep.mubr.bf16.mxu1 %v4006_v59  ;;  %3432 = vmatpush3.bf16.msra.mxu1 %v3592_v52 }
  0xc5   : > { %3433 = vmatprep.subr.bf16.mxu1 %v3594_v29 }
  0xc6   : > { %3386 = vmatpush3.bf16.msra.mxu0 %v3593_v5 }
  0xc7   : > { %3387 = vmatprep.subr.bf16.mxu0 %v3595_v30 }
  0xc8   : > { %3434 = vmatpush3.bf16.msra.mxu1 %v3594_v29  ;;  %v4874_v29 = vld [vmem:[#allocation11_spill] sm:$0xff] }
  0xc9   : > { %1610 = vmatmul.mubr.bf16.gmra.mrb[72].mxu0 %v3971_v38  ;;  %3435 = vmatprep.subr.bf16.mxu1 %v3596_v61 }
  0xca   : > { %1617 = vmatprep.mubr.bf16.mxu0 %v4038_v21  ;;  %3388 = vmatpush3.bf16.msra.mxu0 %v3595_v30 }
  0xcb   : > { %1771 = vmatmul.mubr.bf16.gmra.mrb[72].mxu1 %v3979_v46  ;;  %3389 = vmatprep.subr.bf16.mxu0 %v3597_v62  ;;  %v3602_v46 = vld [vmem:[%s4856_s2 + $0x38] sm:$0xff]  }
  0xcc   : > { %1778 = vmatprep.mubr.bf16.mxu1 %v4036_v19  ;;  %3436 = vmatpush3.bf16.msra.mxu1 %v3596_v61 }
  0xcd   : > { %3437 = vmatprep.subr.bf16.mxu1 %v3598_v25 }
  0xce   : > { %3390 = vmatpush3.bf16.msra.mxu0 %v3597_v62  ;;  %v4876_v62 = vld [vmem:[#allocation10_spill] sm:$0xff] }
  0xcf   : > { %3391 = vmatprep.subr.bf16.mxu0 %v3599_v37 }
  0xd0   : > { %3438 = vmatpush3.bf16.msra.mxu1 %v3598_v25 }
  0xd1   : > { %1618 = vmatmul.mubr.bf16.gmra.mrb[76].mxu0 %v4006_v59  ;;  %3439 = vmatprep.subr.bf16.mxu1 %v3600_v34 }
  0xd2   : > { %1625 = vmatprep.mubr.bf16.mxu0 %v4073_v48  ;;  %3392 = vmatpush3.bf16.msra.mxu0 %v3599_v37 }
  0xd3   : > { %1779 = vmatmul.mubr.bf16.gmra.mrb[76].mxu1 %v4011_v2  ;;  %3393 = vmatprep.subr.bf16.mxu0 %v3601_v43  ;;  %v4358_v2 = vld [vmem:[%s3882_s6 + $0x198] sm:$0xff] }
  0xd4   : > { %1786 = vmatprep.mubr.bf16.mxu1 %v4068_v44  ;;  %3440 = vmatpush3.bf16.msra.mxu1 %v3600_v34  ;;  %v602_v3 = vrot.slane %v4358_v2, 2 }
  0xd5   : > { %3441 = vmatprep.subr.bf16.mxu1 %v3602_v46 }
  0xd6   : > { %3394 = vmatpush3.bf16.msra.mxu0 %v3601_v43 }
  0xd8   : > { %3442 = vmatpush3.bf16.msra.mxu1 %v3602_v46 }
  0xd9   : > { %1626 = vmatmul.mubr.bf16.gmra.mrb[80].mxu0 %v4036_v19 }
  0xda   : > { %1633 = vmatprep.mubr.bf16.mxu0 %v4103_v10 }
  0xdb   : > { %1787 = vmatmul.mubr.bf16.gmra.mrb[80].mxu1 %v4043_v28  ;;  %v4361_v28 = vld [vmem:[%s3882_s6 + $0x1a0] sm:$0xff] }
  0xdc   : > { %1794 = vmatprep.mubr.bf16.mxu1 %v4101_v6 }
  0xe1   : > { %1634 = vmatmul.mubr.bf16.gmra.mrb[84].mxu0 %v4068_v44 }
  0xe2   : > { %1641 = vmatprep.mubr.bf16.mxu0 %v4142_v39 }
  0xe3   : > { %1795 = vmatmul.mubr.bf16.gmra.mrb[84].mxu1 %v4076_v51  ;;  %v603_v51 = vrot.slane %v4361_v28, 2 }
  0xe4   : > { %1802 = vmatprep.mubr.bf16.mxu1 %v4140_v35 }
  0xe5   : > { %v4370_v24 = vsel %vm462_vm1, %v602_v3, %v603_v51  ;;  %v4373_v31 = vsel %vm462_vm1, %v603_v51, %v605_v22 }
  0xe9   : > { %1642 = vmatmul.mubr.bf16.gmra.mrb[88].mxu0 %v4101_v6 }
  0xea   : > { %1649 = vmatprep.mubr.bf16.mxu0 %v4159_v58 }
  0xeb   : > { %1803 = vmatmul.mubr.bf16.gmra.mrb[88].mxu1 %v4108_v13  ;;  %v662_v13 = vpack.c.bf16 %v4373_v31, %v4370_v24 }
  0xec   : > { %1810 = vmatprep.mubr.bf16.mxu1 %v4157_v57 }
  0xf1   : > { %1650 = vmatmul.mubr.bf16.gmra.mrb[92].mxu0 %v4140_v35 }
  0xf2   : > { %1657 = vmatprep.mubr.bf16.mxu0 %v4176_v15 }
  0xf3   : > { %1811 = vmatmul.mubr.bf16.gmra.mrb[92].mxu1 %v4145_v42 }
  0xf4   : > { %1818 = vmatprep.mubr.bf16.mxu1 %v4174_v14 }
  0xf9   : > { %1658 = vmatmul.mubr.bf16.gmra.mrb[96].mxu0 %v4157_v57 }
  0xfa   : > { %1665 = vmatprep.mubr.bf16.mxu0 %v4193_v45 }
  0xfb   : > { %1819 = vmatmul.mubr.bf16.gmra.mrb[96].mxu1 %v4161_v63 }
  0xfc   : > { %1826 = vmatprep.mubr.bf16.mxu1 %v4191_v41 }
 0x101   : > { %1666 = vmatmul.mubr.bf16.gmra.mrb[100].mxu0 %v4174_v14 }
 0x102   : > { %1673 = vmatprep.mubr.bf16.mxu0 %v4210_v8 }
 0x103   : > { %1827 = vmatmul.mubr.bf16.gmra.mrb[100].mxu1 %v4178_v26 }
 0x104   : > { %1834 = vmatprep.mubr.bf16.mxu1 %v4208_v7 }
 0x109   : > { %1674 = vmatmul.mubr.bf16.gmra.mrb[104].mxu0 %v4191_v41 }
 0x10a   : > { %1681 = vmatprep.mubr.bf16.mxu0 %v4227_v47 }
 0x10b   : > { %1835 = vmatmul.mubr.bf16.gmra.mrb[104].mxu1 %v4195_v54  ;;  %v4875_v54 = vld [vmem:[#allocation8_spill] sm:$0xff] }
 0x10c   : > { %v2899_v42 = vpop.f32.mrb[0].mxu0  ;;  %1842 = vmatprep.mubr.bf16.mxu1 %v4873_v1 }
 0x10d   : > { %v2900_v63 = vpop.f32.mrb[1].mxu0  ;;  %v3011_v32 = vpop.f32.mrb[0].mxu1 }
 0x10e   : > { %v2901_v49 = vadd.f32 %v2900_v63, %v2899_v42  ;;  %v2902_v12 = vpop.f32.mrb[2].mxu0  ;;  %v3012_v23 = vpop.f32.mrb[1].mxu1 }
 0x10f   : > { %v2903_v4 = vpop.f32.mrb[3].mxu0  ;;  %v3013_v17 = vadd.f32 %v3012_v23, %v3011_v32  ;;  %v3014_v50 = vpop.f32.mrb[2].mxu1 }
 0x110   : > { %v2904_v26 = vadd.f32 %v2903_v4, %v2902_v12  ;;  %v3015_v20 = vpop.f32.mrb[3].mxu1 }
 0x111   : > { %1682 = vmatmul.mubr.bf16.gmra.mrb[108].mxu0 %v4208_v7  ;;  %v4394_v52 = vadd.f32 %v3013_v17, %v2901_v49  ;;  %v3016_v5 = vadd.f32 %v3015_v20, %v3014_v50 }
 0x112   : > { %1689 = vmatprep.mubr.bf16.mxu0 %v4874_v29 }
 0x113   : > { %1843 = vmatmul.mubr.bf16.gmra.mrb[108].mxu1 %v4875_v54  ;;  %v4398_v30 = vadd.f32 %v3016_v5, %v2904_v26 }
 0x114   : > { %v2905_v61 = vpop.f32.mrb[4].mxu0  ;;  %1850 = vmatprep.mubr.bf16.mxu1 %v4876_v62 }
 0x115   : > { %v2906_v25 = vpop.f32.mrb[5].mxu0  ;;  %v3017_v37 = vpop.f32.mrb[4].mxu1 }
 0x116   : > { %v2907_v34 = vadd.f32 %v2906_v25, %v2905_v61  ;;  %v2908_v43 = vpop.f32.mrb[6].mxu0  ;;  %v3018_v46 = vpop.f32.mrb[5].mxu1 }
 0x117   : > { %v2909_v3 = vpop.f32.mrb[7].mxu0  ;;  %v3019_v51 = vadd.f32 %v3018_v46, %v3017_v37  ;;  %v3020_v22 = vpop.f32.mrb[6].mxu1 }
 0x118   : > { %v2910_v42 = vadd.f32 %v2909_v3, %v2908_v43  ;;  %v3021_v63 = vpop.f32.mrb[7].mxu1  ;;  %v598_v43 = vrot.slane %v4364_v0, 1 }
 0x119   : > { %1690 = vmatmul.mubr.bf16.gmra.mrb[112].mxu0 %v4873_v1  ;;  %v4402_v32 = vadd.f32 %v3019_v51, %v2907_v34  ;;  %v3022_v49 = vadd.f32 %v3021_v63, %v3020_v22  ;;  %v595_v34 = vrot.slane %v4358_v2, 1 }
 0x11a   : > { %1697 = vmatprep.mubr.bf16.mxu0 %v4261_v16 }
 0x11b   : > { %1851 = vmatmul.mubr.bf16.gmra.mrb[112].mxu1 %v4229_v56  ;;  %v4406_v12 = vadd.f32 %v3022_v49, %v2910_v42  ;;  %v596_v56 = vrot.slane %v4361_v28, 1 }
 0x11c   : > { %v2911_v23 = vpop.f32.mrb[8].mxu0  ;;  %1858 = vmatprep.mubr.bf16.mxu1 %v4259_v11 }
 0x11d   : > { %v2912_v4 = vpop.f32.mrb[9].mxu0  ;;  %v3023_v17 = vpop.f32.mrb[8].mxu1  ;;  %v597_v63 = vsel %vm349_vm0, %v595_v34, %v596_v56  ;;  %v599_v49 = vsel %vm349_vm0, %v596_v56, %v598_v43 }
 0x11e   : > { %v2913_v50 = vadd.f32 %v2912_v4, %v2911_v23  ;;  %v2914_v26 = vpop.f32.mrb[10].mxu0  ;;  %v3024_v20 = vpop.f32.mrb[9].mxu1 }
 0x11f   : > { %v2915_v5 = vpop.f32.mrb[11].mxu0  ;;  %v3025_v54 = vadd.f32 %v3024_v20, %v3023_v17  ;;  %v3026_v61 = vpop.f32.mrb[10].mxu1 }
 0x120   : > { %v2916_v25 = vadd.f32 %v2915_v5, %v2914_v26  ;;  %v3027_v37 = vpop.f32.mrb[11].mxu1 }
 0x121   : > { %1698 = vmatmul.mubr.bf16.gmra.mrb[116].mxu0 %v4876_v62  ;;  %v4413_v46 = vadd.f32 %v3025_v54, %v2913_v50  ;;  %v3028_v3 = vadd.f32 %v3027_v37, %v3026_v61  ;;  %v661_v54 = vpack.c.bf16 %v599_v49, %v597_v63  ;;  %v660_v49 = vpack.c.bf16 %v4361_v28, %v4358_v2 }
 0x122   : > { %1705 = vmatprep.mubr.bf16.mxu0 %v4275_v53 }
 0x123   : > { %1859 = vmatmul.mubr.bf16.gmra.mrb[116].mxu1 %v4246_v33  ;;  %v4417_v51 = vadd.f32 %v3028_v3, %v2916_v25 }
 0x124   : > { %v2917_v22 = vpop.f32.mrb[12].mxu0  ;;  %1866 = vmatprep.mubr.bf16.mxu1 %v4267_v36 }
 0x125   : > { %v2918_v42 = vpop.f32.mrb[13].mxu0  ;;  %v3029_v23 = vpop.f32.mrb[12].mxu1 }
 0x126   : > { %v2919_v4 = vadd.f32 %v2918_v42, %v2917_v22  ;;  %v2920_v0 = vpop.f32.mrb[14].mxu0  ;;  %v3030_v17 = vpop.f32.mrb[13].mxu1 }
 0x127   : > { %v2921_v50 = vpop.f32.mrb[15].mxu0  ;;  %v3031_v26 = vadd.f32 %v3030_v17, %v3029_v23  ;;  %v3032_v20 = vpop.f32.mrb[14].mxu1 }
 0x128   : > { %v2922_v5 = vadd.f32 %v2921_v50, %v2920_v0  ;;  %v3033_v33 = vpop.f32.mrb[15].mxu1 }
 0x129   : > { %1706 = vmatmul.mubr.bf16.gmra.mrb[120].mxu0 %v4259_v11  ;;  %v4423_v61 = vadd.f32 %v3031_v26, %v2919_v4  ;;  %v3034_v25 = vadd.f32 %v3033_v33, %v3032_v20 }
 0x12a   : > { %1713 = vmatprep.mubr.bf16.mxu0 %v4279_v55 }
 0x12b   : > { %1867 = vmatmul.mubr.bf16.gmra.mrb[120].mxu1 %v4265_v27  ;;  %v4427_v37 = vadd.f32 %v3034_v25, %v2922_v5 }
 0x12c   : > { %v2923_v34 = vpop.f32.mrb[16].mxu0  ;;  %1874 = vmatprep.mubr.bf16.mxu1 %v661_v54 }
 0x12d   : > { %v2924_v56 = vpop.f32.mrb[17].mxu0  ;;  %v3035_v43 = vpop.f32.mrb[16].mxu1 }
 0x12e   : > { %v2925_v3 = vadd.f32 %v2924_v56, %v2923_v34  ;;  %v2926_v22 = vpop.f32.mrb[18].mxu0  ;;  %v3036_v42 = vpop.f32.mrb[17].mxu1 }
 0x12f   : > { %v2927_v63 = vpop.f32.mrb[19].mxu0  ;;  %v3037_v23 = vadd.f32 %v3036_v42, %v3035_v43  ;;  %v3038_v4 = vpop.f32.mrb[18].mxu1 }
 0x130   : > { %v2928_v0 = vadd.f32 %v2927_v63, %v2926_v22  ;;  %v3039_v17 = vpop.f32.mrb[19].mxu1 }
 0x131   : > { %1714 = vmatmul.mubr.bf16.gmra.mrb[124].mxu0 %v4267_v36  ;;  %v4432_v27 = vadd.f32 %v3037_v23, %v2925_v3  ;;  %v3040_v50 = vadd.f32 %v3039_v17, %v3038_v4 }
 0x132   : > { %3395 = vmatprep.mubr.bf16.mxu0 %v3976_v40 }
 0x133   : > { %1875 = vmatmul.mubr.bf16.gmra.mrb[124].mxu1 %v660_v49  ;;  %v4435_v26 = vadd.f32 %v3040_v50, %v2928_v0 }
 0x134   : > { %v2929_v20 = vpop.f32.mrb[20].mxu0  ;;  %3443 = vmatprep.mubr.bf16.mxu1 %v3925_v9 }
 0x135   : > { %v2930_v5 = vpop.f32.mrb[21].mxu0  ;;  %v3041_v54 = vpop.f32.mrb[20].mxu1 }
 0x136   : > { %v2931_v2 = vadd.f32 %v2930_v5, %v2929_v20  ;;  %v2932_v28 = vpop.f32.mrb[22].mxu0  ;;  %v3042_v33 = vpop.f32.mrb[21].mxu1 }
 0x137   : > { %v2933_v25 = vpop.f32.mrb[23].mxu0  ;;  %v3043_v34 = vadd.f32 %v3042_v33, %v3041_v54  ;;  %v3044_v56 = vpop.f32.mrb[22].mxu1 }
 0x138   : > { %v2934_v43 = vadd.f32 %v2933_v25, %v2932_v28  ;;  %v3045_v3 = vpop.f32.mrb[23].mxu1 }
 0x139   : > { %3396 = vmatmul.mubr.bf16.vlgmr.msra.gmra.mrb[128].mxu0 %v4008_v60  ;;  %v4439_v22 = vadd.f32 %v3043_v34, %v2931_v2  ;;  %v3046_v40 = vadd.f32 %v3045_v3, %v3044_v56 }
 0x13a   : > { %3399 = vmatprep.mubr.bf16.mxu0 %v4038_v21 }
 0x13b   : > { %3444 = vmatmul.mubr.bf16.vlgmr.msra.gmra.mrb[128].mxu1 %v3940_v18  ;;  %v4443_v9 = vadd.f32 %v3046_v40, %v2934_v43 }
 0x13c   : > { %v2935_v42 = vpop.f32.mrb[24].mxu0  ;;  %3447 = vmatprep.mubr.bf16.mxu1 %v3971_v38 }
 0x13d   : > { %v2936_v63 = vpop.f32.mrb[25].mxu0  ;;  %v3047_v49 = vpop.f32.mrb[24].mxu1 }
 0x13e   : > { %v2937_v23 = vadd.f32 %v2936_v63, %v2935_v42  ;;  %v2938_v4 = vpop.f32.mrb[26].mxu0  ;;  %v3048_v0 = vpop.f32.mrb[25].mxu1 }
 0x13f   : > { %v2939_v17 = vpop.f32.mrb[27].mxu0  ;;  %v3049_v50 = vadd.f32 %v3048_v0, %v3047_v49  ;;  %v3050_v60 = vpop.f32.mrb[26].mxu1 }
 0x140   : > { %v2940_v20 = vadd.f32 %v2939_v17, %v2938_v4  ;;  %v3051_v5 = vpop.f32.mrb[27].mxu1 }
 0x141   : > { %3400 = vmatmul.mubr.bf16.gmra.mrb[132].mxu0 %v4073_v48  ;;  %v4447_v21 = vadd.f32 %v3049_v50, %v2937_v23  ;;  %v3052_v18 = vadd.f32 %v3051_v5, %v3050_v60 }
 0x142   : > { %3403 = vmatprep.mubr.bf16.mxu0 %v4103_v10 }
 0x143   : > { %3448 = vmatmul.mubr.bf16.gmra.mrb[132].mxu1 %v4006_v59  ;;  %v4451_v38 = vadd.f32 %v3052_v18, %v2940_v20 }
 0x144   : > { %v2941_v54 = vpop.f32.mrb[28].mxu0  ;;  %3451 = vmatprep.mubr.bf16.mxu1 %v4036_v19 }
 0x145   : > { %v2942_v2 = vpop.f32.mrb[29].mxu0  ;;  %v3053_v28 = vpop.f32.mrb[28].mxu1 }
 0x146   : > { %v2943_v33 = vadd.f32 %v2942_v2, %v2941_v54  ;;  %v2944_v25 = vpop.f32.mrb[30].mxu0  ;;  %v3054_v34 = vpop.f32.mrb[29].mxu1 }
 0x147   : > { %v2945_v56 = vpop.f32.mrb[31].mxu0  ;;  %v3055_v43 = vadd.f32 %v3054_v34, %v3053_v28  ;;  %v3056_v48 = vpop.f32.mrb[30].mxu1 }
 0x148   : > { %v2946_v3 = vadd.f32 %v2945_v56, %v2944_v25  ;;  %v3057_v40 = vpop.f32.mrb[31].mxu1 }
 0x149   : > { %3404 = vmatmul.mubr.bf16.gmra.mrb[136].mxu0 %v4142_v39  ;;  %v4455_v10 = vadd.f32 %v3055_v43, %v2943_v33  ;;  %v3058_v59 = vadd.f32 %v3057_v40, %v3056_v48 }
 0x14a   : > { %3407 = vmatprep.mubr.bf16.mxu0 %v4159_v58 }
 0x14b   : > { %3452 = vmatmul.mubr.bf16.gmra.mrb[136].mxu1 %v4068_v44  ;;  %v4459_v19 = vadd.f32 %v3058_v59, %v2946_v3 }
 0x14c   : > { %v2947_v42 = vpop.f32.mrb[32].mxu0  ;;  %3455 = vmatprep.mubr.bf16.mxu1 %v4101_v6 }
 0x14d   : > { %v2948_v63 = vpop.f32.mrb[33].mxu0  ;;  %v3059_v49 = vpop.f32.mrb[32].mxu1 }
 0x14e   : > { %v2949_v23 = vadd.f32 %v2948_v63, %v2947_v42  ;;  %v2950_v4 = vpop.f32.mrb[34].mxu0  ;;  %v3060_v0 = vpop.f32.mrb[33].mxu1 }
 0x14f   : > { %v2951_v17 = vpop.f32.mrb[35].mxu0  ;;  %v3061_v50 = vadd.f32 %v3060_v0, %v3059_v49  ;;  %v3062_v39 = vpop.f32.mrb[34].mxu1 }
 0x150   : > { %v2952_v60 = vadd.f32 %v2951_v17, %v2950_v4  ;;  %v3063_v20 = vpop.f32.mrb[35].mxu1 }
 0x151   : > { %3408 = vmatmul.mubr.bf16.gmra.mrb[140].mxu0 %v4176_v15  ;;  %v4463_v58 = vadd.f32 %v3061_v50, %v2949_v23  ;;  %v3064_v44 = vadd.f32 %v3063_v20, %v3062_v39 }
 0x152   : > { %3411 = vmatprep.mubr.bf16.mxu0 %v4193_v45 }
 0x153   : > { %3456 = vmatmul.mubr.bf16.gmra.mrb[140].mxu1 %v4140_v35  ;;  %v4467_v6 = vadd.f32 %v3064_v44, %v2952_v60 }
 0x154   : > { %v2953_v5 = vpop.f32.mrb[36].mxu0  ;;  %3459 = vmatprep.mubr.bf16.mxu1 %v4157_v57 }
 0x155   : > { %v2954_v18 = vpop.f32.mrb[37].mxu0  ;;  %v3065_v54 = vpop.f32.mrb[36].mxu1 }
 0x156   : > { %v2955_v2 = vadd.f32 %v2954_v18, %v2953_v5  ;;  %v2956_v28 = vpop.f32.mrb[38].mxu0  ;;  %v3066_v33 = vpop.f32.mrb[37].mxu1 }
 0x157   : > { %v2957_v25 = vpop.f32.mrb[39].mxu0  ;;  %v3067_v34 = vadd.f32 %v3066_v33, %v3065_v54  ;;  %v3068_v15 = vpop.f32.mrb[38].mxu1 }
 0x158   : > { %v2958_v56 = vadd.f32 %v2957_v25, %v2956_v28  ;;  %v3069_v43 = vpop.f32.mrb[39].mxu1 }
 0x159   : > { %3412 = vmatmul.mubr.bf16.gmra.mrb[144].mxu0 %v4210_v8  ;;  %v4471_v45 = vadd.f32 %v3067_v34, %v2955_v2  ;;  %v3070_v35 = vadd.f32 %v3069_v43, %v3068_v15 }
 0x15a   : > { %3415 = vmatprep.mubr.bf16.mxu0 %v4227_v47 }
 0x15b   : > { %3460 = vmatmul.mubr.bf16.gmra.mrb[144].mxu1 %v4174_v14  ;;  %v4475_v57 = vadd.f32 %v3070_v35, %v2958_v56 }
 0x15c   : > { %v2959_v48 = vpop.f32.mrb[40].mxu0  ;;  %3463 = vmatprep.mubr.bf16.mxu1 %v4191_v41 }
 0x15d   : > { %v2960_v3 = vpop.f32.mrb[41].mxu0  ;;  %v3071_v40 = vpop.f32.mrb[40].mxu1 }
 0x15e   : > { %v2961_v59 = vadd.f32 %v2960_v3, %v2959_v48  ;;  %v2962_v42 = vpop.f32.mrb[42].mxu0  ;;  %v3072_v63 = vpop.f32.mrb[41].mxu1 }
 0x15f   : > { %v2963_v49 = vpop.f32.mrb[43].mxu0  ;;  %v3073_v23 = vadd.f32 %v3072_v63, %v3071_v40  ;;  %v3074_v8 = vpop.f32.mrb[42].mxu1 }
 0x160   : > { %v2964_v4 = vadd.f32 %v2963_v49, %v2962_v42  ;;  %v3075_v0 = vpop.f32.mrb[43].mxu1 }
 0x161   : > { %3416 = vmatmul.mubr.bf16.gmra.mrb[148].mxu0 %v4874_v29  ;;  %v4479_v47 = vadd.f32 %v3073_v23, %v2961_v59  ;;  %v3076_v14 = vadd.f32 %v3075_v0, %v3074_v8 }
 0x162   : > { %3419 = vmatprep.mubr.bf16.mxu0 %v4261_v16 }
 0x163   : > { %3464 = vmatmul.mubr.bf16.gmra.mrb[148].mxu1 %v4208_v7  ;;  %v4483_v41 = vadd.f32 %v3076_v14, %v2964_v4 }
 0x164   : > { %v2965_v17 = vpop.f32.mrb[44].mxu0  ;;  %3467 = vmatprep.mubr.bf16.mxu1 %v4873_v1 }
 0x165   : > { %v2966_v50 = vpop.f32.mrb[45].mxu0  ;;  %v3077_v39 = vpop.f32.mrb[44].mxu1 }
 0x166   : > { %v2967_v60 = vadd.f32 %v2966_v50, %v2965_v17  ;;  %v2968_v20 = vpop.f32.mrb[46].mxu0  ;;  %v3078_v44 = vpop.f32.mrb[45].mxu1 }
 0x167   : > { %v2969_v5 = vpop.f32.mrb[47].mxu0  ;;  %v3079_v18 = vadd.f32 %v3078_v44, %v3077_v39  ;;  %v3080_v29 = vpop.f32.mrb[46].mxu1 }
 0x168   : > { %v2970_v54 = vadd.f32 %v2969_v5, %v2968_v20  ;;  %v3081_v2 = vpop.f32.mrb[47].mxu1 }
 0x169   : > { %3420 = vmatmul.mubr.bf16.gmra.mrb[152].mxu0 %v4275_v53  ;;  %v4487_v16 = vadd.f32 %v3079_v18, %v2967_v60  ;;  %v3082_v7 = vadd.f32 %v3081_v2, %v3080_v29 }
 0x16a   : > { %3423 = vmatprep.mubr.bf16.mxu0 %v4279_v55 }
 0x16b   : > { %3468 = vmatmul.mubr.bf16.gmra.mrb[152].mxu1 %v4876_v62  ;;  %v4491_v1 = vadd.f32 %v3082_v7, %v2970_v54 }
 0x16c   : > { %v2971_v28 = vpop.f32.mrb[48].mxu0  ;;  %3471 = vmatprep.mubr.bf16.mxu1 %v4259_v11 }
 0x16d   : > { %v2972_v33 = vpop.f32.mrb[49].mxu0  ;;  %v3083_v25 = vpop.f32.mrb[48].mxu1 }
 0x16e   : > { %v2973_v34 = vadd.f32 %v2972_v33, %v2971_v28  ;;  %v2974_v15 = vpop.f32.mrb[50].mxu0  ;;  %v3084_v56 = vpop.f32.mrb[49].mxu1 }
 0x16f   : > { %v2975_v43 = vpop.f32.mrb[51].mxu0  ;;  %v3085_v35 = vadd.f32 %v3084_v56, %v3083_v25  ;;  %v3086_v53 = vpop.f32.mrb[50].mxu1 }
 0x170   : > { %v2976_v48 = vadd.f32 %v2975_v43, %v2974_v15  ;;  %v3087_v3 = vpop.f32.mrb[51].mxu1 }
 0x171   : > { %3424 = vmatmul.mubr.bf16.gmra.mrb[156].mxu0 %v662_v13  ;;  %v4497_v55 = vadd.f32 %v3085_v35, %v2973_v34  ;;  %v3088_v62 = vadd.f32 %v3087_v3, %v3086_v53 }
 0x173   : > { %3472 = vmatmul.mubr.bf16.gmra.mrb[156].mxu1 %v4267_v36  ;;  %v4500_v11 = vadd.f32 %v3088_v62, %v2976_v48 }
 0x174   : > { %v2977_v40 = vpop.f32.mrb[52].mxu0 }
 0x175   : > { %v2978_v59 = vpop.f32.mrb[53].mxu0  ;;  %v3089_v42 = vpop.f32.mrb[52].mxu1 }
 0x176   : > { %v2979_v63 = vadd.f32 %v2978_v59, %v2977_v40  ;;  %v2980_v49 = vpop.f32.mrb[54].mxu0  ;;  %v3090_v23 = vpop.f32.mrb[53].mxu1 }
 0x177   : > { %v2981_v8 = vpop.f32.mrb[55].mxu0  ;;  %v3091_v4 = vadd.f32 %v3090_v23, %v3089_v42  ;;  %v3092_v0 = vpop.f32.mrb[54].mxu1 }
 0x178   : > { %v2982_v14 = vadd.f32 %v2981_v8, %v2980_v49  ;;  %v3093_v17 = vpop.f32.mrb[55].mxu1 }
 0x179   : > { %v4502_v24 = vadd.f32 %v3091_v4, %v2979_v63  ;;  %v3094_v31 = vadd.f32 %v3093_v17, %v3092_v0 }
 0x17b   : > { %v4504_v13 = vadd.f32 %v3094_v31, %v2982_v14 }
 0x17c   : > { %v2983_v50 = vpop.f32.mrb[56].mxu0 }
 0x17d   : > { %v2984_v36 = vpop.f32.mrb[57].mxu0  ;;  %v3095_v39 = vpop.f32.mrb[56].mxu1 }
 0x17e   : > { %v2985_v60 = vadd.f32 %v2984_v36, %v2983_v50  ;;  %v2986_v20 = vpop.f32.mrb[58].mxu0  ;;  %v3096_v44 = vpop.f32.mrb[57].mxu1 }
 0x17f   : > { %v2987_v5 = vpop.f32.mrb[59].mxu0  ;;  %v3097_v18 = vadd.f32 %v3096_v44, %v3095_v39  ;;  %v3098_v29 = vpop.f32.mrb[58].mxu1 }
 0x180   : > { %v2988_v54 = vadd.f32 %v2987_v5, %v2986_v20  ;;  %v3099_v2 = vpop.f32.mrb[59].mxu1 }
 0x181   : > { %v4506_v7 = vadd.f32 %v3097_v18, %v2985_v60  ;;  %v3100_v28 = vadd.f32 %v3099_v2, %v3098_v29 }
 0x183   : > { %v4508_v33 = vadd.f32 %v3100_v28, %v2988_v54 }
 0x184   : > { %v2989_v25 = vpop.f32.mrb[60].mxu0 }
 0x185   : > { %v2990_v34 = vpop.f32.mrb[61].mxu0  ;;  %v3101_v15 = vpop.f32.mrb[60].mxu1 }
 0x186   : > { %v2991_v56 = vadd.f32 %v2990_v34, %v2989_v25  ;;  %v2992_v43 = vpop.f32.mrb[62].mxu0  ;;  %v3102_v35 = vpop.f32.mrb[61].mxu1 }
 0x187   : > { %v2993_v53 = vpop.f32.mrb[63].mxu0  ;;  %v3103_v48 = vadd.f32 %v3102_v35, %v3101_v15  ;;  %v3104_v3 = vpop.f32.mrb[62].mxu1 }
 0x188   : > { %v2994_v62 = vadd.f32 %v2993_v53, %v2992_v43  ;;  %v3105_v40 = vpop.f32.mrb[63].mxu1 }
 0x189   : > { %v4510_v59 = vadd.f32 %v3103_v48, %v2991_v56  ;;  %v3106_v42 = vadd.f32 %v3105_v40, %v3104_v3 }
 0x18b   : > { %v4512_v63 = vadd.f32 %v3106_v42, %v2994_v62 }
 0x18c   : > { %v3123_v49 = vpop.f32.mrb[64].mxu0 }
 0x18d   : > { %v3124_v23 = vpop.f32.mrb[65].mxu0 }
 0x18e   : > { %v3235_v8 = vpop.f32.mrb[64].mxu1  ;;  %v3125_v4 = vadd.f32 %v3124_v23, %v3123_v49  ;;  %v3126_v0 = vpop.f32.mrb[66].mxu0 }
 0x18f   : > { %v3236_v14 = vpop.f32.mrb[65].mxu1  ;;  %v3127_v17 = vpop.f32.mrb[67].mxu0 }
 0x190   : > { %v1596_v31 = vadd.f32 %v3125_v4, %v4394_v52  ;;  %v3237_v50 = vadd.f32 %v3236_v14, %v3235_v8  ;;  %v3238_v36 = vpop.f32.mrb[66].mxu1  ;;  %v3128_v39 = vadd.f32 %v3127_v17, %v3126_v0 }
 0x191   : > { %v3239_v60 = vpop.f32.mrb[67].mxu1 }
 0x192   : > { %v1599_v20 = vadd.f32 %v3128_v39, %v4398_v30  ;;  %v3240_v44 = vadd.f32 %v3239_v60, %v3238_v36  ;;  %v4516_v5 = vadd.f32 %v3237_v50, %v1596_v31 }
 0x194   : > { %v3129_v18 = vpop.f32.mrb[68].mxu0  ;;  %v4518_v29 = vadd.f32 %v3240_v44, %v1599_v20 }
 0x195   : > { %v3130_v54 = vpop.f32.mrb[69].mxu0 }
 0x196   : > { %v3241_v2 = vpop.f32.mrb[68].mxu1  ;;  %v3131_v28 = vadd.f32 %v3130_v54, %v3129_v18  ;;  %v3132_v25 = vpop.f32.mrb[70].mxu0 }
 0x197   : > { %v3242_v34 = vpop.f32.mrb[69].mxu1  ;;  %v3133_v15 = vpop.f32.mrb[71].mxu0 }
 0x198   : > { %v1604_v52 = vadd.f32 %v3131_v28, %v4402_v32  ;;  %v3243_v56 = vadd.f32 %v3242_v34, %v3241_v2  ;;  %v3244_v43 = vpop.f32.mrb[70].mxu1  ;;  %v3134_v35 = vadd.f32 %v3133_v15, %v3132_v25 }
 0x199   : > { %v3245_v53 = vpop.f32.mrb[71].mxu1 }
 0x19a   : > { %v1607_v30 = vadd.f32 %v3134_v35, %v4406_v12  ;;  %v3246_v48 = vadd.f32 %v3245_v53, %v3244_v43  ;;  %v4522_v3 = vadd.f32 %v3243_v56, %v1604_v52 }
 0x19c   : > { %v3135_v62 = vpop.f32.mrb[72].mxu0  ;;  %v4524_v40 = vadd.f32 %v3246_v48, %v1607_v30 }
 0x19d   : > { %v3136_v42 = vpop.f32.mrb[73].mxu0 }
 0x19e   : > { %v3247_v49 = vpop.f32.mrb[72].mxu1  ;;  %v3137_v23 = vadd.f32 %v3136_v42, %v3135_v62  ;;  %v3138_v8 = vpop.f32.mrb[74].mxu0 }
 0x19f   : > { %v3248_v4 = vpop.f32.mrb[73].mxu1  ;;  %v3139_v0 = vpop.f32.mrb[75].mxu0 }
 0x1a0   : > { %v1612_v32 = vadd.f32 %v3137_v23, %v4413_v46  ;;  %v3249_v14 = vadd.f32 %v3248_v4, %v3247_v49  ;;  %v3250_v17 = vpop.f32.mrb[74].mxu1  ;;  %v3140_v31 = vadd.f32 %v3139_v0, %v3138_v8 }
 0x1a1   : > { %v3251_v50 = vpop.f32.mrb[75].mxu1 }
 0x1a2   : > { %v1615_v12 = vadd.f32 %v3140_v31, %v4417_v51  ;;  %v3252_v36 = vadd.f32 %v3251_v50, %v3250_v17  ;;  %v4528_v39 = vadd.f32 %v3249_v14, %v1612_v32 }
 0x1a4   : > { %v3141_v60 = vpop.f32.mrb[76].mxu0  ;;  %v4530_v20 = vadd.f32 %v3252_v36, %v1615_v12 }
 0x1a5   : > { %v3142_v44 = vpop.f32.mrb[77].mxu0 }
 0x1a6   : > { %v3253_v18 = vpop.f32.mrb[76].mxu1  ;;  %v3143_v54 = vadd.f32 %v3142_v44, %v3141_v60  ;;  %v3144_v2 = vpop.f32.mrb[78].mxu0 }
 0x1a7   : > { %v3254_v28 = vpop.f32.mrb[77].mxu1  ;;  %v3145_v25 = vpop.f32.mrb[79].mxu0 }
 0x1a8   : > { %v1620_v46 = vadd.f32 %v3143_v54, %v4423_v61  ;;  %v3255_v34 = vadd.f32 %v3254_v28, %v3253_v18  ;;  %v3256_v15 = vpop.f32.mrb[78].mxu1  ;;  %v3146_v52 = vadd.f32 %v3145_v25, %v3144_v2 }
 0x1a9   : > { %v3257_v56 = vpop.f32.mrb[79].mxu1 }
 0x1aa   : > { %v1623_v51 = vadd.f32 %v3146_v52, %v4427_v37  ;;  %v3258_v43 = vadd.f32 %v3257_v56, %v3256_v15  ;;  %v4534_v35 = vadd.f32 %v3255_v34, %v1620_v46 }
 0x1ac   : > { %v3147_v53 = vpop.f32.mrb[80].mxu0  ;;  %v4536_v30 = vadd.f32 %v3258_v43, %v1623_v51 }
 0x1ad   : > { %v3148_v48 = vpop.f32.mrb[81].mxu0 }
 0x1ae   : > { %v3259_v62 = vpop.f32.mrb[80].mxu1  ;;  %v3149_v42 = vadd.f32 %v3148_v48, %v3147_v53  ;;  %v3150_v49 = vpop.f32.mrb[82].mxu0 }
 0x1af   : > { %v3260_v23 = vpop.f32.mrb[81].mxu1  ;;  %v3151_v8 = vpop.f32.mrb[83].mxu0 }
 0x1b0   : > { %v1628_v61 = vadd.f32 %v3149_v42, %v4432_v27  ;;  %v3261_v4 = vadd.f32 %v3260_v23, %v3259_v62  ;;  %v3262_v0 = vpop.f32.mrb[82].mxu1  ;;  %v3152_v32 = vadd.f32 %v3151_v8, %v3150_v49 }
 0x1b1   : > { %v3263_v14 = vpop.f32.mrb[83].mxu1 }
 0x1b2   : > { %v1631_v37 = vadd.f32 %v3152_v32, %v4435_v26  ;;  %v3264_v17 = vadd.f32 %v3263_v14, %v3262_v0  ;;  %v4540_v31 = vadd.f32 %v3261_v4, %v1628_v61 }
 0x1b4   : > { %v3153_v50 = vpop.f32.mrb[84].mxu0  ;;  %v4542_v12 = vadd.f32 %v3264_v17, %v1631_v37 }
 0x1b5   : > { %v3154_v36 = vpop.f32.mrb[85].mxu0 }
 0x1b6   : > { %v3265_v60 = vpop.f32.mrb[84].mxu1  ;;  %v3155_v44 = vadd.f32 %v3154_v36, %v3153_v50  ;;  %v3156_v18 = vpop.f32.mrb[86].mxu0 }
 0x1b7   : > { %v3266_v54 = vpop.f32.mrb[85].mxu1  ;;  %v3157_v2 = vpop.f32.mrb[87].mxu0 }
 0x1b8   : > { %v1636_v27 = vadd.f32 %v3155_v44, %v4439_v22  ;;  %v3267_v28 = vadd.f32 %v3266_v54, %v3265_v60  ;;  %v3268_v25 = vpop.f32.mrb[86].mxu1  ;;  %v3158_v46 = vadd.f32 %v3157_v2, %v3156_v18 }
 0x1b9   : > { %v3269_v34 = vpop.f32.mrb[87].mxu1 }
 0x1ba   : > { %v1639_v26 = vadd.f32 %v3158_v46, %v4443_v9  ;;  %v3270_v15 = vadd.f32 %v3269_v34, %v3268_v25  ;;  %v4546_v52 = vadd.f32 %v3267_v28, %v1636_v27 }
 0x1bc   : > { %v3159_v56 = vpop.f32.mrb[88].mxu0  ;;  %v4548_v51 = vadd.f32 %v3270_v15, %v1639_v26 }
 0x1bd   : > { %v3160_v43 = vpop.f32.mrb[89].mxu0 }
 0x1be   : > { %v3271_v53 = vpop.f32.mrb[88].mxu1  ;;  %v3161_v48 = vadd.f32 %v3160_v43, %v3159_v56  ;;  %v3162_v62 = vpop.f32.mrb[90].mxu0 }
 0x1bf   : > { %v3272_v42 = vpop.f32.mrb[89].mxu1  ;;  %v3163_v49 = vpop.f32.mrb[91].mxu0 }
 0x1c0   : > { %v1644_v22 = vadd.f32 %v3161_v48, %v4447_v21  ;;  %v3273_v23 = vadd.f32 %v3272_v42, %v3271_v53  ;;  %v3274_v8 = vpop.f32.mrb[90].mxu1  ;;  %v3164_v61 = vadd.f32 %v3163_v49, %v3162_v62 }
 0x1c1   : > { %v3275_v4 = vpop.f32.mrb[91].mxu1 }
 0x1c2   : > { %v1647_v9 = vadd.f32 %v3164_v61, %v4451_v38  ;;  %v3276_v0 = vadd.f32 %v3275_v4, %v3274_v8  ;;  %v4552_v32 = vadd.f32 %v3273_v23, %v1644_v22 }
 0x1c4   : > { %v3165_v14 = vpop.f32.mrb[92].mxu0  ;;  %v4554_v37 = vadd.f32 %v3276_v0, %v1647_v9 }
 0x1c5   : > { %v3166_v17 = vpop.f32.mrb[93].mxu0 }
 0x1c6   : > { %v3277_v50 = vpop.f32.mrb[92].mxu1  ;;  %v3167_v36 = vadd.f32 %v3166_v17, %v3165_v14  ;;  %v3168_v60 = vpop.f32.mrb[94].mxu0 }
 0x1c7   : > { %v3278_v44 = vpop.f32.mrb[93].mxu1  ;;  %v3169_v18 = vpop.f32.mrb[95].mxu0 }
 0x1c8   : > { %v1652_v21 = vadd.f32 %v3167_v36, %v4455_v10  ;;  %v3279_v54 = vadd.f32 %v3278_v44, %v3277_v50  ;;  %v3280_v2 = vpop.f32.mrb[94].mxu1  ;;  %v3170_v27 = vadd.f32 %v3169_v18, %v3168_v60 }
 0x1c9   : > { %v3281_v28 = vpop.f32.mrb[95].mxu1 }
 0x1ca   : > { %v1655_v38 = vadd.f32 %v3170_v27, %v4459_v19  ;;  %v3282_v25 = vadd.f32 %v3281_v28, %v3280_v2  ;;  %v4558_v46 = vadd.f32 %v3279_v54, %v1652_v21  ;;  %v3699_v28 = vmov 0.0  }
 0x1cb   : > { %2517 = vst [vmem:[%s4577_s25] sm:$0xff] %v3699_v28  ;;  %2518 = vst [vmem:[%s4577_s25 + $0x8] sm:$0xff] %v3699_v28 }
 0x1cc   : > { %v3171_v34 = vpop.f32.mrb[96].mxu0  ;;  %v4560_v26 = vadd.f32 %v3282_v25, %v1655_v38  ;;  %2519 = vst [vmem:[%s4577_s25 + $0x10] sm:$0x3] %v3699_v28  ;;  %2840 = vst [vmem:[%s4577_s25 + $0x198] sm:$0xff] %v3699_v28 }
 0x1cd   : > { %v3172_v15 = vpop.f32.mrb[97].mxu0  ;;  %2841 = vst [vmem:[%s4577_s25 + $0x1a0] sm:$0xff] %v3699_v28  ;;  %2842 = vst [vmem:[%s4577_s25 + $0x1a8] sm:$0x3] %v3699_v28 }
 0x1ce   : > { %v3283_v56 = vpop.f32.mrb[96].mxu1  ;;  %v3173_v43 = vadd.f32 %v3172_v15, %v3171_v34  ;;  %v3174_v53 = vpop.f32.mrb[98].mxu0  ;;  %2525 = vst [vmem:[%s4577_s25 + $0x18] sm:$0x1] %v3699_v28  ;;  %2526 = vst [vmem:[%s4577_s25 + $0x30] sm:$0x1] %v3699_v28 }
 0x1cf   : > { %v3284_v48 = vpop.f32.mrb[97].mxu1  ;;  %v3175_v62 = vpop.f32.mrb[99].mxu0  ;;  %2527 = vst [vmem:[%s4577_s25 + $0x48] sm:$0x1] %v3699_v28  ;;  %2528 = vst [vmem:[%s4577_s25 + $0x60] sm:$0x1] %v3699_v28 }
 0x1d0   : > { %v1660_v10 = vadd.f32 %v3173_v43, %v4463_v58  ;;  %v3285_v42 = vadd.f32 %v3284_v48, %v3283_v56  ;;  %v3286_v49 = vpop.f32.mrb[98].mxu1  ;;  %v3176_v22 = vadd.f32 %v3175_v62, %v3174_v53  ;;  %2529 = vst [vmem:[%s4577_s25 + $0x78] sm:$0x1] %v3699_v28  ;;  %2530 = vst [vmem:[%s4577_s25 + $0x90] sm:$0x1] %v3699_v28 }
 0x1d1   : > { %v3287_v23 = vpop.f32.mrb[99].mxu1  ;;  %2531 = vst [vmem:[%s4577_s25 + $0xa8] sm:$0x1] %v3699_v28  ;;  %2532 = vst [vmem:[%s4577_s25 + $0xc0] sm:$0x1] %v3699_v28 }
 0x1d2   : > { %v1663_v19 = vadd.f32 %v3176_v22, %v4467_v6  ;;  %v3288_v8 = vadd.f32 %v3287_v23, %v3286_v49  ;;  %v4564_v61 = vadd.f32 %v3285_v42, %v1660_v10  ;;  %2533 = vst [vmem:[%s4577_s25 + $0xd8] sm:$0x1] %v3699_v28  ;;  %2534 = vst [vmem:[%s4577_s25 + $0xf0] sm:$0x1] %v3699_v28 }
 0x1d3   : > { %2535 = vst [vmem:[%s4577_s25 + $0x108] sm:$0x1] %v3699_v28  ;;  %2536 = vst [vmem:[%s4577_s25 + $0x120] sm:$0x1] %v3699_v28 }
 0x1d4   : > { %v3177_v4 = vpop.f32.mrb[100].mxu0  ;;  %v4566_v9 = vadd.f32 %v3288_v8, %v1663_v19  ;;  %2537 = vst [vmem:[%s4577_s25 + $0x138] sm:$0x1] %v3699_v28  ;;  %2538 = vst [vmem:[%s4577_s25 + $0x150] sm:$0x1] %v3699_v28 }
 0x1d5   : > { %v3178_v0 = vpop.f32.mrb[101].mxu0  ;;  %2539 = vst [vmem:[%s4577_s25 + $0x168] sm:$0x1] %v3699_v28  ;;  %2540 = vst [vmem:[%s4577_s25 + $0x180] sm:$0x1] %v3699_v28 }
 0x1d6   : > { %v3289_v14 = vpop.f32.mrb[100].mxu1  ;;  %v3179_v17 = vadd.f32 %v3178_v0, %v3177_v4  ;;  %v3180_v50 = vpop.f32.mrb[102].mxu0  ;;  %2543 = vst [vmem:[%s4577_s25 + $0x29] sm:$0x1] %v3699_v28  ;;  %2544 = vst [vmem:[%s4577_s25 + $0x41] sm:$0x1] %v3699_v28 }
 0x1d7   : > { %v3290_v36 = vpop.f32.mrb[101].mxu1  ;;  %v3181_v60 = vpop.f32.mrb[103].mxu0  ;;  %2545 = vst [vmem:[%s4577_s25 + $0x59] sm:$0x1] %v3699_v28  ;;  %2546 = vst [vmem:[%s4577_s25 + $0x71] sm:$0x1] %v3699_v28 }
 0x1d8   : > { %v1668_v58 = vadd.f32 %v3179_v17, %v4471_v45  ;;  %v3291_v44 = vadd.f32 %v3290_v36, %v3289_v14  ;;  %v3292_v18 = vpop.f32.mrb[102].mxu1  ;;  %v3182_v21 = vadd.f32 %v3181_v60, %v3180_v50  ;;  %2547 = vst [vmem:[%s4577_s25 + $0x89] sm:$0x1] %v3699_v28  ;;  %2548 = vst [vmem:[%s4577_s25 + $0xa1] sm:$0x1] %v3699_v28 }
 0x1d9   : > { %v3293_v54 = vpop.f32.mrb[103].mxu1  ;;  %2549 = vst [vmem:[%s4577_s25 + $0xb9] sm:$0x1] %v3699_v28  ;;  %2550 = vst [vmem:[%s4577_s25 + $0xd1] sm:$0x1] %v3699_v28 }
 0x1da   : > { %v1671_v6 = vadd.f32 %v3182_v21, %v4475_v57  ;;  %v3294_v2 = vadd.f32 %v3293_v54, %v3292_v18  ;;  %v4570_v27 = vadd.f32 %v3291_v44, %v1668_v58  ;;  %2551 = vst [vmem:[%s4577_s25 + $0xe9] sm:$0x1] %v3699_v28  ;;  %2552 = vst [vmem:[%s4577_s25 + $0x101] sm:$0x1] %v3699_v28 }
 0x1db   : > { %2553 = vst [vmem:[%s4577_s25 + $0x119] sm:$0x1] %v3699_v28  ;;  %2554 = vst [vmem:[%s4577_s25 + $0x131] sm:$0x1] %v3699_v28 }
 0x1dc   : > { %v3183_v45 = vpop.f32.mrb[104].mxu0  ;;  %v4579_v57 = vadd.f32 %v3294_v2, %v1671_v6  ;;  %2555 = vst [vmem:[%s4577_s25 + $0x149] sm:$0x1] %v3699_v28  ;;  %2556 = vst [vmem:[%s4577_s25 + $0x161] sm:$0x1] %v3699_v28 }
 0x1dd   : > { %2557 = vst [vmem:[%s4577_s25 + $0x179] sm:$0x1] %v3699_v28  ;;  %2558 = vst [vmem:[%s4577_s25 + $0x191] sm:$0x1] %v3699_v28  ;;  %v3184_v38 = vpop.f32.mrb[105].mxu0 }
 0x1de   : > { %2524 = vst [vmem:[%s4577_s25] sm:$0x1] %v3699_v28  ;;  %2541 = vst [vmem:[%s4577_s25 + $0x198] sm:$0x1] %v3699_v28  ;;  %v3295_v25 = vpop.f32.mrb[104].mxu1  ;;  %v3185_v34 = vadd.f32 %v3184_v38, %v3183_v45  ;;  %v3186_v15 = vpop.f32.mrb[106].mxu0 }
 0x1df   : > { %2542 = vst [vmem:[%s4577_s25 + $0x11] sm:$0x1] %v3699_v28  ;;  %2559 = vst [vmem:[%s4577_s25 + $0x1a9] sm:$0x1] %v3699_v28  ;;  %v3296_v56 = vpop.f32.mrb[105].mxu1  ;;  %v3187_v43 = vpop.f32.mrb[107].mxu0 }
 0x1e0   : > { %v1676_v53 = vadd.f32 %v3185_v34, %v4479_v47  ;;  %v3297_v48 = vadd.f32 %v3296_v56, %v3295_v25  ;;  %v3298_v62 = vpop.f32.mrb[106].mxu1  ;;  %v3188_v10 = vadd.f32 %v3187_v43, %v3186_v15 }
 0x1e1   : > { %v3299_v42 = vpop.f32.mrb[107].mxu1 }
 0x1e2   : > { %v1679_v49 = vadd.f32 %v3188_v10, %v4483_v41  ;;  %v3300_v22 = vadd.f32 %v3299_v42, %v3298_v62  ;;  %v4625_v23 = vadd.f32 %v3297_v48, %v1676_v53 }
 0x1e4   : > { %v3189_v19 = vpop.f32.mrb[108].mxu0  ;;  %v4627_v8 = vadd.f32 %v3300_v22, %v1679_v49 }
 0x1e5   : > { %v3190_v4 = vpop.f32.mrb[109].mxu0 }
 0x1e6   : > { %v3301_v0 = vpop.f32.mrb[108].mxu1  ;;  %v3191_v14 = vadd.f32 %v3190_v4, %v3189_v19  ;;  %v3192_v17 = vpop.f32.mrb[110].mxu0 }
 0x1e7   : > { %v3302_v50 = vpop.f32.mrb[109].mxu1  ;;  %v3193_v36 = vpop.f32.mrb[111].mxu0 }
 0x1e8   : > { %v1684_v47 = vadd.f32 %v3191_v14, %v4487_v16  ;;  %v3303_v60 = vadd.f32 %v3302_v50, %v3301_v0  ;;  %v3304_v58 = vpop.f32.mrb[110].mxu1  ;;  %v3194_v44 = vadd.f32 %v3193_v36, %v3192_v17 }
 0x1e9   : > { %v3305_v18 = vpop.f32.mrb[111].mxu1 }
 0x1ea   : > { %v1687_v41 = vadd.f32 %v3194_v44, %v4491_v1  ;;  %v3306_v21 = vadd.f32 %v3305_v18, %v3304_v58  ;;  %v4631_v54 = vadd.f32 %v3303_v60, %v1684_v47 }
 0x1ec   : > { %v3195_v6 = vpop.f32.mrb[112].mxu0  ;;  %v4633_v2 = vadd.f32 %v3306_v21, %v1687_v41 }
 0x1ed   : > { %v3196_v45 = vpop.f32.mrb[113].mxu0 }
 0x1ee   : > { %v3307_v28 = vpop.f32.mrb[112].mxu1  ;;  %v3197_v38 = vadd.f32 %v3196_v45, %v3195_v6  ;;  %v3198_v25 = vpop.f32.mrb[114].mxu0 }
 0x1ef   : > { %v3308_v34 = vpop.f32.mrb[113].mxu1  ;;  %v3199_v15 = vpop.f32.mrb[115].mxu0 }
 0x1f0   : > { %v1692_v16 = vadd.f32 %v3197_v38, %v4497_v55  ;;  %v3309_v56 = vadd.f32 %v3308_v34, %v3307_v28  ;;  %v3310_v43 = vpop.f32.mrb[114].mxu1  ;;  %v3200_v53 = vadd.f32 %v3199_v15, %v3198_v25 }
 0x1f1   : > { %v3311_v48 = vpop.f32.mrb[115].mxu1 }
 0x1f2   : > { %v1695_v1 = vadd.f32 %v3200_v53, %v4500_v11  ;;  %v3312_v62 = vadd.f32 %v3311_v48, %v3310_v43  ;;  %v4637_v10 = vadd.f32 %v3309_v56, %v1692_v16 }
 0x1f4   : > { %v3201_v42 = vpop.f32.mrb[116].mxu0  ;;  %v4639_v49 = vadd.f32 %v3312_v62, %v1695_v1 }
 0x1f5   : > { %v3202_v22 = vpop.f32.mrb[117].mxu0 }
 0x1f6   : > { %v3313_v19 = vpop.f32.mrb[116].mxu1  ;;  %v3203_v4 = vadd.f32 %v3202_v22, %v3201_v42  ;;  %v3204_v0 = vpop.f32.mrb[118].mxu0 }
 0x1f7   : > { %v3314_v14 = vpop.f32.mrb[117].mxu1  ;;  %v3205_v17 = vpop.f32.mrb[119].mxu0 }
 0x1f8   : > { %v1700_v55 = vadd.f32 %v3203_v4, %v4502_v24  ;;  %v3315_v50 = vadd.f32 %v3314_v14, %v3313_v19  ;;  %v3316_v36 = vpop.f32.mrb[118].mxu1  ;;  %v3206_v47 = vadd.f32 %v3205_v17, %v3204_v0 }
 0x1f9   : > { %v3317_v60 = vpop.f32.mrb[119].mxu1 }
 0x1fa   : > { %v1703_v11 = vadd.f32 %v3206_v47, %v4504_v13  ;;  %v3318_v58 = vadd.f32 %v3317_v60, %v3316_v36  ;;  %v4643_v44 = vadd.f32 %v3315_v50, %v1700_v55 }
 0x1fc   : > { %v3207_v18 = vpop.f32.mrb[120].mxu0  ;;  %v4645_v41 = vadd.f32 %v3318_v58, %v1703_v11 }
 0x1fd   : > { %v3208_v21 = vpop.f32.mrb[121].mxu0 }
 0x1fe   : > { %v3319_v6 = vpop.f32.mrb[120].mxu1  ;;  %v3209_v45 = vadd.f32 %v3208_v21, %v3207_v18  ;;  %v3210_v28 = vpop.f32.mrb[122].mxu0 }
 0x1ff   : > { %v3320_v38 = vpop.f32.mrb[121].mxu1  ;;  %v3211_v25 = vpop.f32.mrb[123].mxu0 }
 0x200   : > { %v1708_v24 = vadd.f32 %v3209_v45, %v4506_v7  ;;  %v3321_v34 = vadd.f32 %v3320_v38, %v3319_v6  ;;  %v3322_v15 = vpop.f32.mrb[122].mxu1  ;;  %v3212_v16 = vadd.f32 %v3211_v25, %v3210_v28 }
 0x201   : > { %v3323_v56 = vpop.f32.mrb[123].mxu1 }
 0x202   : > { %v1711_v13 = vadd.f32 %v3212_v16, %v4508_v33  ;;  %v3324_v43 = vadd.f32 %v3323_v56, %v3322_v15  ;;  %v4649_v53 = vadd.f32 %v3321_v34, %v1708_v24 }
 0x204   : > { %v3213_v48 = vpop.f32.mrb[124].mxu0  ;;  %v4651_v1 = vadd.f32 %v3324_v43, %v1711_v13 }
 0x205   : > { %v3214_v62 = vpop.f32.mrb[125].mxu0 }
 0x206   : > { %v3325_v42 = vpop.f32.mrb[124].mxu1  ;;  %v3215_v22 = vadd.f32 %v3214_v62, %v3213_v48  ;;  %v3216_v19 = vpop.f32.mrb[126].mxu0 }
 0x207   : > { %v3326_v7 = vpop.f32.mrb[125].mxu1  ;;  %v3217_v4 = vpop.f32.mrb[127].mxu0 }
 0x208   : > { %v1716_v0 = vadd.f32 %v3215_v22, %v4510_v59  ;;  %v3327_v14 = vadd.f32 %v3326_v7, %v3325_v42  ;;  %v3328_v33 = vpop.f32.mrb[126].mxu1  ;;  %v3218_v17 = vadd.f32 %v3217_v4, %v3216_v19 }
 0x209   : > { %v3329_v55 = vpop.f32.mrb[127].mxu1 }
 0x20a   : > { %v1719_v50 = vadd.f32 %v3218_v17, %v4512_v63  ;;  %v3330_v36 = vadd.f32 %v3329_v55, %v3328_v33  ;;  %v4659_v47 = vadd.f32 %v3327_v14, %v1716_v0 }
 0x20c   : > { %v3397_v60 = vpop.f32.mrb[128].mxu0  ;;  %v4661_v11 = vadd.f32 %v3330_v36, %v1719_v50 }
 0x20d   : > { %v1926_v58 = vadd.f32 %v3397_v60, %v4522_v3  ;;  %v1917_v18 = vpop.f32.mrb[129].mxu0 }
 0x20e   : > { %v3445_v59 = vpop.f32.mrb[128].mxu1  ;;  %v1918_v21 = vadd.f32 %v1917_v18, %v4516_v5  ;;  %v3398_v6 = vpop.f32.mrb[130].mxu0 }
 0x20f   : > { %2845 = vst [vmem:[%s4577_s25 + $0x31] sm:$0xff] %v1926_v58  ;;  %2487 = vst [vmem:[%s4666_s26 + $0x10] sm:$0xff] %v3445_v59  ;;  %v2250_v63 = vpop.f32.mrb[129].mxu1  ;;  %v1929_v45 = vadd.f32 %v3398_v6, %v4524_v40  ;;  %v1920_v28 = vpop.f32.mrb[131].mxu0  ;;  %v2084_v13 = vmul.f32 %v1926_v58, %v1926_v58  ;;  %v2417_v40 = vmul.f32 %v3445_v59, %v3445_v59 }
 0x210   : > { %2843 = vst [vmem:[%s4577_s25 + $0x19] sm:$0xff] %v1918_v21  ;;  %v2415_v3 = vmul.f32 %v2250_v63, %v2250_v63  ;;  %2485 = vst [vmem:[%s4666_s26] sm:$0xff] %v2250_v63  ;;  %v3446_v38 = vpop.f32.mrb[130].mxu1  ;;  %v1921_v5 = vadd.f32 %v1920_v28, %v4518_v29  ;;  %v2082_v25 = vmul.f32 %v1918_v21, %v1918_v21 }
 0x211   : > { %2846 = vst [vmem:[%s4577_s25 + $0x39] sm:$0xff] %v1929_v45  ;;  %2488 = vst [vmem:[%s4666_s26 + $0x18] sm:$0xff] %v3446_v38  ;;  %v2253_v24 = vpop.f32.mrb[131].mxu1  ;;  %v2085_v29 = vmul.f32 %v1929_v45, %v1929_v45  ;;  %v2418_v50 = vmul.f32 %v3446_v38, %v3446_v38 }
 0x212   : > { %v2044_v34 = vadd.f32 %v1921_v5, %v1918_v21  ;;  %v2083_v15 = vmul.f32 %v1921_v5, %v1921_v5  ;;  %2844 = vst [vmem:[%s4577_s25 + $0x21] sm:$0xff] %v1921_v5  ;;  %v2377_v16 = vadd.f32 %v2253_v24, %v2250_v63  ;;  %v2416_v56 = vmul.f32 %v2253_v24, %v2253_v24 }
 0x213   : > { %2486 = vst [vmem:[%s4666_s26 + $0x8] sm:$0xff] %v2253_v24 }
 0x214   : > { %v2045_v43 = vadd.f32 %v2044_v34, %v1926_v58  ;;  %v2114_v48 = vadd.f32 %v2083_v15, %v2082_v25  ;;  %v2378_v62 = vadd.f32 %v3445_v59, %v2377_v16  ;;  %v2447_v42 = vadd.f32 %v2416_v56, %v2415_v3  ;;  %v3401_v22 = vpop.f32.mrb[132].mxu0 }
 0x215   : > { %v1942_v19 = vadd.f32 %v3401_v22, %v4534_v35  ;;  %v1933_v7 = vpop.f32.mrb[133].mxu0 }
 0x216   : > { %v2115_v4 = vadd.f32 %v2114_v48, %v2084_v13  ;;  %v2448_v0 = vadd.f32 %v2447_v42, %v2417_v40  ;;  %v3449_v14 = vpop.f32.mrb[132].mxu1  ;;  %v1934_v33 = vadd.f32 %v1933_v7, %v4528_v39  ;;  %v2046_v17 = vadd.f32 %v2045_v43, %v1929_v45  ;;  %v3402_v55 = vpop.f32.mrb[134].mxu0 }
 0x217   : > { %2849 = vst [vmem:[%s4577_s25 + $0x61] sm:$0xff] %v1942_v19  ;;  %2491 = vst [vmem:[%s4666_s26 + $0x30] sm:$0xff] %v3449_v14  ;;  %v2266_v36 = vpop.f32.mrb[133].mxu1  ;;  %v2379_v60 = vadd.f32 %v3446_v38, %v2378_v62  ;;  %v1945_v58 = vadd.f32 %v3402_v55, %v4536_v30  ;;  %v1936_v35 = vpop.f32.mrb[135].mxu0  ;;  %v2421_v16 = vmul.f32 %v3449_v14, %v3449_v14 }
 0x218   : > { %v2047_v18 = vadd.f32 %v2046_v17, %v1934_v33  ;;  %v2086_v59 = vmul.f32 %v1934_v33, %v1934_v33  ;;  %v2116_v21 = vadd.f32 %v2115_v4, %v2085_v29  ;;  %2847 = vst [vmem:[%s4577_s25 + $0x49] sm:$0xff] %v1934_v33  ;;  %v2419_v6 = vmul.f32 %v2266_v36, %v2266_v36  ;;  %v3450_v39 = vpop.f32.mrb[134].mxu1 }
 0x219   : > { %2489 = vst [vmem:[%s4666_s26 + $0x20] sm:$0xff] %v2266_v36  ;;  %v2380_v63 = vadd.f32 %v2379_v60, %v2266_v36  ;;  %v2449_v45 = vadd.f32 %v2448_v0, %v2418_v50  ;;  %2850 = vst [vmem:[%s4577_s25 + $0x69] sm:$0xff] %v1945_v58  ;;  %v2269_v28 = vpop.f32.mrb[135].mxu1  ;;  %v1937_v38 = vadd.f32 %v1936_v35, %v4530_v20 }
 0x21a   : > { %2492 = vst [vmem:[%s4666_s26 + $0x38] sm:$0xff] %v3450_v39  ;;  %v2117_v3 = vadd.f32 %v2116_v21, %v2086_v59  ;;  %v2420_v5 = vmul.f32 %v2269_v28, %v2269_v28  ;;  %2490 = vst [vmem:[%s4666_s26 + $0x28] sm:$0xff] %v2269_v28  ;;  %v2088_v48 = vmul.f32 %v1942_v19, %v1942_v19 }
 0x21b   : > { %v2450_v30 = vadd.f32 %v2449_v45, %v2419_v6  ;;  %v2381_v25 = vadd.f32 %v2380_v63, %v2269_v28  ;;  %v2048_v24 = vadd.f32 %v2047_v18, %v1937_v38  ;;  %v2087_v34 = vmul.f32 %v1937_v38, %v1937_v38  ;;  %2848 = vst [vmem:[%s4577_s25 + $0x51] sm:$0xff] %v1937_v38 }
 0x21c   : > { %v3405_v15 = vpop.f32.mrb[136].mxu0  ;;  %v2089_v7 = vmul.f32 %v1945_v58, %v1945_v58  ;;  %v2422_v4 = vmul.f32 %v3450_v39, %v3450_v39 }
 0x21d   : > { %v2382_v56 = vadd.f32 %v3449_v14, %v2381_v25  ;;  %v2451_v13 = vadd.f32 %v2450_v30, %v2420_v5  ;;  %v1958_v40 = vadd.f32 %v3405_v15, %v4546_v52  ;;  %v1949_v43 = vpop.f32.mrb[137].mxu0  ;;  %v2049_v62 = vadd.f32 %v2048_v24, %v1942_v19 }
 0x21e   : > { %v2118_v20 = vadd.f32 %v2117_v3, %v2087_v34  ;;  %v3453_v42 = vpop.f32.mrb[136].mxu1  ;;  %v1950_v22 = vadd.f32 %v1949_v43, %v4540_v31  ;;  %v3406_v29 = vpop.f32.mrb[138].mxu0 }
 0x21f   : > { %v2452_v0 = vadd.f32 %v2451_v13, %v2421_v16  ;;  %2853 = vst [vmem:[%s4577_s25 + $0x91] sm:$0xff] %v1958_v40  ;;  %2495 = vst [vmem:[%s4666_s26 + $0x50] sm:$0xff] %v3453_v42  ;;  %v2282_v14 = vpop.f32.mrb[137].mxu1  ;;  %v2383_v33 = vadd.f32 %v3450_v39, %v2382_v56  ;;  %v1952_v17 = vpop.f32.mrb[139].mxu0  ;;  %v2050_v55 = vadd.f32 %v2049_v62, %v1945_v58 }
 0x220   : > { %v2119_v52 = vadd.f32 %v2118_v20, %v2088_v48  ;;  %v2090_v19 = vmul.f32 %v1950_v22, %v1950_v22  ;;  %2851 = vst [vmem:[%s4577_s25 + $0x79] sm:$0xff] %v1950_v22  ;;  %v2423_v50 = vmul.f32 %v2282_v14, %v2282_v14  ;;  %2493 = vst [vmem:[%s4666_s26 + $0x40] sm:$0xff] %v2282_v14  ;;  %v3454_v36 = vpop.f32.mrb[138].mxu1 }
 0x221   : > { %v2384_v31 = vadd.f32 %v2383_v33, %v2282_v14  ;;  %v2453_v60 = vadd.f32 %v2452_v0, %v2422_v4  ;;  %v1961_v35 = vadd.f32 %v3406_v29, %v4548_v51  ;;  %2496 = vst [vmem:[%s4666_s26 + $0x58] sm:$0xff] %v3454_v36  ;;  %v2285_v18 = vpop.f32.mrb[139].mxu1  ;;  %v2051_v59 = vadd.f32 %v2050_v55, %v1950_v22 }
 0x222   : > { %v2120_v21 = vadd.f32 %v2119_v52, %v2089_v7  ;;  %v1953_v6 = vadd.f32 %v1952_v17, %v4542_v12  ;;  %v2424_v39 = vmul.f32 %v2285_v18, %v2285_v18  ;;  %2494 = vst [vmem:[%s4666_s26 + $0x48] sm:$0xff] %v2285_v18  ;;  %v2425_v5 = vmul.f32 %v3453_v42, %v3453_v42 }
 0x223   : > { %v2454_v58 = vadd.f32 %v2453_v60, %v2423_v50  ;;  %2854 = vst [vmem:[%s4577_s25 + $0x99] sm:$0xff] %v1961_v35  ;;  %v2385_v63 = vadd.f32 %v2384_v31, %v2285_v18  ;;  %v2092_v34 = vmul.f32 %v1958_v40, %v1958_v40  ;;  %v2093_v43 = vmul.f32 %v1961_v35, %v1961_v35 }
 0x224   : > { %v2121_v45 = vadd.f32 %v2120_v21, %v2090_v19  ;;  %v2052_v28 = vadd.f32 %v2051_v59, %v1953_v6  ;;  %v2091_v3 = vmul.f32 %v1953_v6, %v1953_v6  ;;  %2852 = vst [vmem:[%s4577_s25 + $0x81] sm:$0xff] %v1953_v6  ;;  %v3409_v38 = vpop.f32.mrb[140].mxu0  ;;  %v2426_v48 = vmul.f32 %v3454_v36, %v3454_v36 }
 0x225   : > { %v2386_v51 = vadd.f32 %v3453_v42, %v2385_v63  ;;  %v2455_v30 = vadd.f32 %v2454_v58, %v2424_v39  ;;  %v1974_v25 = vadd.f32 %v3409_v38, %v4558_v46  ;;  %v1965_v24 = vpop.f32.mrb[141].mxu0 }
 0x226   : > { %v2053_v12 = vadd.f32 %v2052_v28, %v1958_v40  ;;  %v2122_v15 = vadd.f32 %v2121_v45, %v2091_v3  ;;  %v3457_v16 = vpop.f32.mrb[140].mxu1  ;;  %v1966_v56 = vadd.f32 %v1965_v24, %v4552_v32  ;;  %v3410_v13 = vpop.f32.mrb[142].mxu0 }
 0x227   : > { %v2456_v62 = vadd.f32 %v2455_v30, %v2425_v5  ;;  %2857 = vst [vmem:[%s4577_s25 + $0xc1] sm:$0xff] %v1974_v25  ;;  %2499 = vst [vmem:[%s4666_s26 + $0x70] sm:$0xff] %v3457_v16  ;;  %v2298_v20 = vpop.f32.mrb[141].mxu1  ;;  %v2387_v42 = vadd.f32 %v3454_v36, %v2386_v51  ;;  %v1968_v22 = vpop.f32.mrb[143].mxu0  ;;  %v1977_v14 = vadd.f32 %v3410_v13, %v4560_v26 }
 0x228   : > { %v2123_v46 = vadd.f32 %v2122_v15, %v2092_v34  ;;  %v2054_v29 = vadd.f32 %v2053_v12, %v1961_v35  ;;  %v2094_v40 = vmul.f32 %v1966_v56, %v1966_v56  ;;  %2855 = vst [vmem:[%s4577_s25 + $0xa9] sm:$0xff] %v1966_v56  ;;  %v2427_v7 = vmul.f32 %v2298_v20, %v2298_v20  ;;  %v3458_v4 = vpop.f32.mrb[142].mxu1 }
 0x229   : > { %2497 = vst [vmem:[%s4666_s26 + $0x60] sm:$0xff] %v2298_v20  ;;  %v2388_v32 = vadd.f32 %v2387_v42, %v2298_v20  ;;  %v2457_v0 = vadd.f32 %v2456_v62, %v2426_v48  ;;  %2500 = vst [vmem:[%s4666_s26 + $0x78] sm:$0xff] %v3458_v4  ;;  %v2301_v33 = vpop.f32.mrb[143].mxu1  ;;  %v1969_v55 = vadd.f32 %v1968_v22, %v4554_v37 }
 0x22a   : > { %v2055_v17 = vadd.f32 %v2054_v29, %v1966_v56  ;;  %v2124_v52 = vadd.f32 %v2123_v46, %v2093_v43  ;;  %v2428_v19 = vmul.f32 %v2301_v33, %v2301_v33  ;;  %2498 = vst [vmem:[%s4666_s26 + $0x68] sm:$0xff] %v2301_v33  ;;  %2858 = vst [vmem:[%s4577_s25 + $0xc9] sm:$0xff] %v1977_v14 }
 0x22b   : > { %v2458_v50 = vadd.f32 %v2457_v0, %v2427_v7  ;;  %v2389_v36 = vadd.f32 %v2388_v32, %v2301_v33  ;;  %v2095_v35 = vmul.f32 %v1969_v55, %v1969_v55  ;;  %2856 = vst [vmem:[%s4577_s25 + $0xb1] sm:$0xff] %v1969_v55  ;;  %v2429_v59 = vmul.f32 %v3457_v16, %v3457_v16 }
 0x22c   : > { %v2125_v31 = vadd.f32 %v2124_v52, %v2094_v40  ;;  %v2056_v60 = vadd.f32 %v2055_v17, %v1969_v55  ;;  %v3413_v18 = vpop.f32.mrb[144].mxu0  ;;  %v2096_v58 = vmul.f32 %v1974_v25, %v1974_v25  ;;  %v2097_v38 = vmul.f32 %v1977_v14, %v1977_v14 }
 0x22d   : > { %v2390_v26 = vadd.f32 %v3457_v16, %v2389_v36  ;;  %v2459_v21 = vadd.f32 %v2458_v50, %v2428_v19  ;;  %v1990_v6 = vadd.f32 %v3413_v18, %v4570_v27  ;;  %v1981_v39 = vpop.f32.mrb[145].mxu0  ;;  %v2430_v5 = vmul.f32 %v3458_v4, %v3458_v4 }
 0x22e   : > { %v2057_v37 = vadd.f32 %v2056_v60, %v1974_v25  ;;  %v2126_v63 = vadd.f32 %v2125_v31, %v2095_v35  ;;  %v3461_v45 = vpop.f32.mrb[144].mxu1  ;;  %v1982_v28 = vadd.f32 %v1981_v39, %v4564_v61  ;;  %v3414_v3 = vpop.f32.mrb[146].mxu0 }
 0x22f   : > { %v2460_v51 = vadd.f32 %v2459_v21, %v2429_v59  ;;  %2861 = vst [vmem:[%s4577_s25 + $0xf1] sm:$0xff] %v1990_v6  ;;  %2503 = vst [vmem:[%s4666_s26 + $0x90] sm:$0xff] %v3461_v45  ;;  %v2314_v30 = vpop.f32.mrb[145].mxu1  ;;  %v2391_v24 = vadd.f32 %v3458_v4, %v2390_v26  ;;  %v1984_v34 = vpop.f32.mrb[147].mxu0  ;;  %v1993_v13 = vadd.f32 %v3414_v3, %v4579_v57 }
 0x230   : > { %v2127_v27 = vadd.f32 %v2126_v63, %v2096_v58  ;;  %v2058_v12 = vadd.f32 %v2057_v37, %v1977_v14  ;;  %v2098_v25 = vmul.f32 %v1982_v28, %v1982_v28  ;;  %2859 = vst [vmem:[%s4577_s25 + $0xd9] sm:$0xff] %v1982_v28  ;;  %v2431_v15 = vmul.f32 %v2314_v30, %v2314_v30  ;;  %v3462_v16 = vpop.f32.mrb[146].mxu1 }
 0x231   : > { %2501 = vst [vmem:[%s4666_s26 + $0x80] sm:$0xff] %v2314_v30  ;;  %v2392_v61 = vadd.f32 %v2391_v24, %v2314_v30  ;;  %v2461_v56 = vadd.f32 %v2460_v51, %v2430_v5  ;;  %2504 = vst [vmem:[%s4666_s26 + $0x98] sm:$0xff] %v3462_v16  ;;  %v2317_v43 = vpop.f32.mrb[147].mxu1  ;;  %v1985_v20 = vadd.f32 %v1984_v34, %v4566_v9 }
 0x232   : > { %v2059_v48 = vadd.f32 %v2058_v12, %v1982_v28  ;;  %v2128_v62 = vadd.f32 %v2127_v27, %v2097_v38  ;;  %v2432_v42 = vmul.f32 %v2317_v43, %v2317_v43  ;;  %2502 = vst [vmem:[%s4666_s26 + $0x88] sm:$0xff] %v2317_v43  ;;  %2862 = vst [vmem:[%s4577_s25 + $0xf9] sm:$0xff] %v1993_v13 }
 0x233   : > { %v2462_v22 = vadd.f32 %v2461_v56, %v2431_v15  ;;  %v2393_v46 = vadd.f32 %v2392_v61, %v2317_v43  ;;  %v2099_v7 = vmul.f32 %v1985_v20, %v1985_v20  ;;  %2860 = vst [vmem:[%s4577_s25 + $0xe1] sm:$0xff] %v1985_v20  ;;  %v2433_v32 = vmul.f32 %v3461_v45, %v3461_v45 }
 0x234   : > { %v2129_v29 = vadd.f32 %v2128_v62, %v2098_v25  ;;  %v2060_v40 = vadd.f32 %v2059_v48, %v1985_v20  ;;  %v3417_v4 = vpop.f32.mrb[148].mxu0  ;;  %v2100_v17 = vmul.f32 %v1990_v6, %v1990_v6  ;;  %v2101_v36 = vmul.f32 %v1993_v13, %v1993_v13 }
 0x235   : > { %v2394_v57 = vadd.f32 %v3461_v45, %v2393_v46  ;;  %v2463_v0 = vadd.f32 %v2462_v22, %v2432_v42  ;;  %v2006_v14 = vadd.f32 %v3417_v4, %v4631_v54  ;;  %v1997_v33 = vpop.f32.mrb[149].mxu0  ;;  %v2434_v31 = vmul.f32 %v3462_v16, %v3462_v16 }
 0x236   : > { %v2061_v9 = vadd.f32 %v2060_v40, %v1990_v6  ;;  %v2130_v52 = vadd.f32 %v2129_v29, %v2099_v7  ;;  %v3465_v55 = vpop.f32.mrb[148].mxu1  ;;  %v1998_v19 = vadd.f32 %v1997_v33, %v4625_v23  ;;  %v3418_v50 = vpop.f32.mrb[150].mxu0 }
 0x237   : > { %v2464_v60 = vadd.f32 %v2463_v0, %v2433_v32  ;;  %2865 = vst [vmem:[%s4577_s25 + $0x121] sm:$0xff] %v2006_v14  ;;  %2507 = vst [vmem:[%s4666_s26 + $0xb0] sm:$0xff] %v3465_v55  ;;  %v2330_v35 = vpop.f32.mrb[149].mxu1  ;;  %v2395_v18 = vadd.f32 %v3462_v16, %v2394_v57  ;;  %v2000_v59 = vpop.f32.mrb[151].mxu0  ;;  %v2009_v37 = vadd.f32 %v3418_v50, %v4633_v2 }
 0x238   : > { %v2131_v54 = vadd.f32 %v2130_v52, %v2100_v17  ;;  %v2062_v26 = vadd.f32 %v2061_v9, %v1993_v13  ;;  %v2102_v21 = vmul.f32 %v1998_v19, %v1998_v19  ;;  %2863 = vst [vmem:[%s4577_s25 + $0x109] sm:$0xff] %v1998_v19  ;;  %v2435_v6 = vmul.f32 %v2330_v35, %v2330_v35  ;;  %v3466_v39 = vpop.f32.mrb[150].mxu1 }
 0x239   : > { %2505 = vst [vmem:[%s4666_s26 + $0xa0] sm:$0xff] %v2330_v35  ;;  %v2396_v23 = vadd.f32 %v2395_v18, %v2330_v35  ;;  %v2465_v58 = vadd.f32 %v2464_v60, %v2434_v31  ;;  %2508 = vst [vmem:[%s4666_s26 + $0xb8] sm:$0xff] %v3466_v39  ;;  %v2333_v63 = vpop.f32.mrb[151].mxu1  ;;  %v2001_v3 = vadd.f32 %v2000_v59, %v4627_v8 }
 0x23a   : > { %v2063_v45 = vadd.f32 %v2062_v26, %v1998_v19  ;;  %v2132_v28 = vadd.f32 %v2131_v54, %v2101_v36  ;;  %v2436_v38 = vmul.f32 %v2333_v63, %v2333_v63  ;;  %2506 = vst [vmem:[%s4666_s26 + $0xa8] sm:$0xff] %v2333_v63  ;;  %2866 = vst [vmem:[%s4577_s25 + $0x129] sm:$0xff] %v2009_v37 }
 0x23b   : > { %v2466_v5 = vadd.f32 %v2465_v58, %v2435_v6  ;;  %v2397_v51 = vadd.f32 %v2396_v23, %v2333_v63  ;;  %v2103_v34 = vmul.f32 %v2001_v3, %v2001_v3  ;;  %2864 = vst [vmem:[%s4577_s25 + $0x111] sm:$0xff] %v2001_v3  ;;  %v2437_v12 = vmul.f32 %v3465_v55, %v3465_v55 }
 0x23c   : > { %v2133_v30 = vadd.f32 %v2132_v28, %v2102_v21  ;;  %v2064_v24 = vadd.f32 %v2063_v45, %v2001_v3  ;;  %v3421_v27 = vpop.f32.mrb[152].mxu0  ;;  %v2104_v61 = vmul.f32 %v2006_v14, %v2006_v14  ;;  %v2105_v62 = vmul.f32 %v2009_v37, %v2009_v37 }
 0x23d   : > { %v2398_v2 = vadd.f32 %v3465_v55, %v2397_v51  ;;  %v2467_v25 = vadd.f32 %v2466_v5, %v2436_v38  ;;  %v2022_v15 = vadd.f32 %v3421_v27, %v4643_v44  ;;  %v2013_v16 = vpop.f32.mrb[153].mxu0  ;;  %v2438_v20 = vmul.f32 %v3466_v39, %v3466_v39 }
 0x23e   : > { %v2065_v8 = vadd.f32 %v2064_v24, %v2006_v14  ;;  %v2134_v56 = vadd.f32 %v2133_v30, %v2103_v34  ;;  %v3469_v13 = vpop.f32.mrb[152].mxu1  ;;  %v2014_v43 = vadd.f32 %v2013_v16, %v4637_v10  ;;  %v3422_v48 = vpop.f32.mrb[154].mxu0 }
 0x23f   : > { %v2468_v42 = vadd.f32 %v2467_v25, %v2437_v12  ;;  %2869 = vst [vmem:[%s4577_s25 + $0x151] sm:$0xff] %v2022_v15  ;;  %2511 = vst [vmem:[%s4666_s26 + $0xd0] sm:$0xff] %v3469_v13  ;;  %v2346_v22 = vpop.f32.mrb[153].mxu1  ;;  %v2399_v46 = vadd.f32 %v3466_v39, %v2398_v2  ;;  %v2016_v29 = vpop.f32.mrb[155].mxu0  ;;  %v2025_v0 = vadd.f32 %v3422_v48, %v4645_v41 }
 0x240   : > { %v2135_v44 = vadd.f32 %v2134_v56, %v2104_v61  ;;  %v2066_v40 = vadd.f32 %v2065_v8, %v2009_v37  ;;  %v2106_v7 = vmul.f32 %v2014_v43, %v2014_v43  ;;  %2867 = vst [vmem:[%s4577_s25 + $0x139] sm:$0xff] %v2014_v43  ;;  %v2439_v4 = vmul.f32 %v2346_v22, %v2346_v22  ;;  %v3470_v32 = vpop.f32.mrb[154].mxu1 }
 0x241   : > { %2509 = vst [vmem:[%s4666_s26 + $0xc0] sm:$0xff] %v2346_v22  ;;  %v2400_v10 = vadd.f32 %v2399_v46, %v2346_v22  ;;  %v2469_v57 = vadd.f32 %v2468_v42, %v2438_v20  ;;  %2512 = vst [vmem:[%s4666_s26 + $0xd8] sm:$0xff] %v3470_v32  ;;  %v2349_v14 = vpop.f32.mrb[155].mxu1  ;;  %v2017_v9 = vadd.f32 %v2016_v29, %v4639_v49 }
 0x242   : > { %v2067_v33 = vadd.f32 %v2066_v40, %v2014_v43  ;;  %v2136_v17 = vadd.f32 %v2135_v44, %v2105_v62  ;;  %v2440_v52 = vmul.f32 %v2349_v14, %v2349_v14  ;;  %2510 = vst [vmem:[%s4666_s26 + $0xc8] sm:$0xff] %v2349_v14  ;;  %2870 = vst [vmem:[%s4577_s25 + $0x159] sm:$0xff] %v2025_v0 }
 0x243   : > { %v2470_v55 = vadd.f32 %v2469_v57, %v2439_v4  ;;  %v2401_v19 = vadd.f32 %v2400_v10, %v2349_v14  ;;  %v2107_v31 = vmul.f32 %v2017_v9, %v2017_v9  ;;  %2868 = vst [vmem:[%s4577_s25 + $0x141] sm:$0xff] %v2017_v9  ;;  %v2441_v41 = vmul.f32 %v3469_v13, %v3469_v13 }
 0x244   : > { %v2137_v50 = vadd.f32 %v2136_v17, %v2106_v7  ;;  %v2068_v36 = vadd.f32 %v2067_v33, %v2017_v9  ;;  %v3425_v60 = vpop.f32.mrb[156].mxu0  ;;  %v2108_v54 = vmul.f32 %v2022_v15, %v2022_v15  ;;  %v2109_v58 = vmul.f32 %v2025_v0, %v2025_v0 }
 0x245   : > { %v2402_v35 = vadd.f32 %v3469_v13, %v2401_v19  ;;  %v2471_v18 = vadd.f32 %v2470_v55, %v2440_v52  ;;  %v4752_v59 = vadd.f32 %v3425_v60, %v4659_v47  ;;  %v2029_v49 = vpop.f32.mrb[157].mxu0  ;;  %v2442_v37 = vmul.f32 %v3470_v32, %v3470_v32 }
 0x246   : > { %v2069_v26 = vadd.f32 %v2068_v36, %v2022_v15  ;;  %v2138_v21 = vadd.f32 %v2137_v50, %v2107_v31  ;;  %v4754_v6 = vpop.f32.mrb[156].mxu1  ;;  %v2030_v39 = vadd.f32 %v2029_v49, %v4649_v53  ;;  %v3426_v23 = vpop.f32.mrb[158].mxu0 }
 0x247   : > { %v2472_v63 = vadd.f32 %v2471_v18, %v2441_v41  ;;  %2873 = vst [vmem:[%s4577_s25 + $0x181] sm:$0xff] %v4752_v59  ;;  %2515 = vst [vmem:[%s4666_s26 + $0xf0] sm:$0xff] %v4754_v6  ;;  %v2362_v47 = vpop.f32.mrb[157].mxu1  ;;  %v2403_v45 = vadd.f32 %v3470_v32, %v2402_v35  ;;  %v2032_v28 = vpop.f32.mrb[159].mxu0  ;;  %v2041_v34 = vadd.f32 %v3426_v23, %v4661_v11 }
 0x248   : > { %v2139_v53 = vadd.f32 %v2138_v21, %v2108_v54  ;;  %v2070_v3 = vadd.f32 %v2069_v26, %v2025_v0  ;;  %v2110_v38 = vmul.f32 %v2030_v39, %v2030_v39  ;;  %2871 = vst [vmem:[%s4577_s25 + $0x169] sm:$0xff] %v2030_v39  ;;  %v2443_v5 = vmul.f32 %v2362_v47, %v2362_v47  ;;  %v3474_v51 = vpop.f32.mrb[158].mxu1 }
 0x249   : > { %2513 = vst [vmem:[%s4666_s26 + $0xe0] sm:$0xff] %v2362_v47  ;;  %v2404_v30 = vadd.f32 %v2403_v45, %v2362_v47  ;;  %v2473_v24 = vadd.f32 %v2472_v63, %v2442_v37  ;;  %2516 = vst [vmem:[%s4666_s26 + $0xf8] sm:$0xff] %v3474_v51  ;;  %v2365_v27 = vpop.f32.mrb[159].mxu1  ;;  %v2033_v25 = vadd.f32 %v2032_v28, %v4651_v1 }
 0x24a   : > { %v2071_v12 = vadd.f32 %v2070_v3, %v2030_v39  ;;  %v2140_v2 = vadd.f32 %v2139_v53, %v2109_v58  ;;  %v2444_v15 = vmul.f32 %v2365_v27, %v2365_v27  ;;  %2514 = vst [vmem:[%s4666_s26 + $0xe8] sm:$0xff] %v2365_v27  ;;  %2874 = vst [vmem:[%s4577_s25 + $0x189] sm:$0xff] %v2041_v34 }
 0x24b   : > { %v2474_v16 = vadd.f32 %v2473_v24, %v2443_v5  ;;  %v2405_v61 = vadd.f32 %v2404_v30, %v2365_v27 }
 0x24c   : > { %3616 = shalt.err (!%p3613_p3)
}
 0x24d   : > { %s3617_s6 = scalar_lea.hbm %s4764_s11, 4096  ;;  %s3621_s26 = scalar_lea.hbm %s4858_s4, 8192 }
 0x24e   : > { %p3618_p4 = scmp.ne.s32.totalorder %s4764_s11, %s3617_s6  ;;  %p3622_p9 = scmp.lt.u32.totalorder %s4764_s11, %s4858_s4 }
 0x24f   : > { %p3623_p10 = scmp.lt.u32.totalorder %s3621_s26, %s3617_s6  ;;  %p3625_p12 = scmp.lt.u32.totalorder %s3617_s6, %s4764_s11 }
 0x250   : > { %p3619_p7 = pnand %p3618_p4, %p3772_p5 }
 0x251   : > { %p3624_p11 = por %p3623_p10, %p3622_p9 }
 0x252   : > { %p3620_p8 = pneg %p3619_p7 }
 0x253   : > { %p3626_p13 = por %p3625_p12, %p3624_p11 }
 0x255   : > { %p3627_p0 = pnand %p3626_p13, %p3620_p8 }
 0x257   : > { %3630 = shalt.err (!%p3627_p0)
}
 0x258   : > { %s3701_s9 = smov 128   ;;  %s3702_s13 = smov 8   ;;  %v2141_v1 = vadd.f32 %v2140_v2, %v2110_v38  ;;  %v2072_v11 = vadd.f32 %v2071_v12, %v2033_v25  ;;  %v2111_v8 = vmul.f32 %v2033_v25, %v2033_v25  ;;  %2872 = vst [vmem:[%s4577_s25 + $0x171] sm:$0xff] %v2033_v25  ;;  %v2445_v56 = vmul.f32 %v4754_v6, %v4754_v6 }
 0x259   : > { %3476 = dma.vmem_to_hbm [thread:$0]  (%p3772_p5), %s4766_s7, 4096, %s4764_s11, %s2599_s12, %s3701_s9, %s3701_s9, %s3702_s13   ;;  %v2406_v13 = vadd.f32 %v4754_v6, %v2405_v61  ;;  %v2475_v43 = vadd.f32 %v2474_v16, %v2444_v15  ;;  %v2112_v48 = vmul.f32 %v4752_v59, %v4752_v59  ;;  %v2446_v42 = vmul.f32 %v3474_v51, %v3474_v51 }
 0x25a   : > { %v2073_v62 = vadd.f32 %v2072_v11, %v4752_v59  ;;  %v2142_v20 = vadd.f32 %v2141_v1, %v2111_v8  ;;  %v2113_v29 = vmul.f32 %v2041_v34, %v2041_v34  ;;  %s2757_s25 = sshll.u32 %s4654_s17, 2  ;;  %s2879_s7 = sshll.u32 %s3755_s22, 6 }
 0x25b   : > { %v2407_v22 = vadd.f32 %v3474_v51, %v2406_v13  ;;  %v2476_v46 = vadd.f32 %v2475_v43, %v2445_v56  ;;  %s235_s11 = scalar_lea.vmem [#allocation4], %s2757_s25  ;;  %s4811_s16 = scalar_lea.hbm %s4859_s5, %s2879_s7 }
 0x25c   : > { %v2074_v44 = vadd.f32 %v2073_v62, %v2041_v34  ;;  %v2143_v40 = vadd.f32 %v2142_v20, %v2112_v48  ;;  %s2636_s12 = sshll.u32 %s235_s11, 4  ;;  %s2604_s22 = scalar_lea.sflag [#allocation5], %s4654_s17  ;;  %s4813_s12 = int_to_ptr.vmem [resolvable:$true] %s2636_s12 }
 0x25d   : > { %v2408_v7 = vrot.slane %v2407_v22, 4  ;;  %v2477_v4 = vadd.f32 %v2476_v46, %v2446_v42  ;;  %s3631_s6 = scalar_lea.vmem %s4813_s12, 64  ;;  %s3703_s23 = smov [#allocation4]  }
 0x25e   : > { %v2075_v32 = vrot.slane %v2074_v44, 4  ;;  %v2144_v10 = vadd.f32 %v2143_v40, %v2113_v29  ;;  %p3632_p1 = scmp.ne.s32.totalorder %s4813_s12, %s3631_s6  ;;  %s3635_s10 = sshll.u32 %s3703_s23, 4  ;;  %s3636_s10 = int_to_ptr.vmem [resolvable:$false] %s3635_s10 }
 0x25f   : > { %v2409_v57 = vadd.f32 %v2408_v7, %v2407_v22  ;;  %v2478_v0 = vrot.slane %v2477_v4, 4  ;;  %s3637_s26 = scalar_lea.vmem %s3636_s10, 128  ;;  %p3638_p4 = scmp.lt.s32.totalorder %s4813_s12, %s3636_s10 }
 0x260   : > { %v2076_v14 = vadd.f32 %v2075_v32, %v2074_v44  ;;  %v2145_v33 = vrot.slane %v2144_v10, 4  ;;  %p3633_p2 = pnand %p3632_p1, %p3772_p5  ;;  %p3639_p7 = scmp.lt.s32.totalorder %s3637_s26, %s3631_s6 }
 0x261   : > { %v2410_v17 = vrot.slane %v2409_v57, 2  ;;  %v2479_v9 = vadd.f32 %v2478_v0, %v2477_v4 }
 0x262   : > { %v2077_v52 = vrot.slane %v2076_v14, 2  ;;  %v2146_v55 = vadd.f32 %v2145_v33, %v2144_v10  ;;  %p3634_p3 = pneg %p3633_p2  ;;  %p3640_p8 = por %p3639_p7, %p3638_p4 }
 0x263   : > { %v2411_v19 = vadd.f32 %v2410_v17, %v2409_v57  ;;  %v2480_v50 = vrot.slane %v2479_v9, 2 }
 0x264   : > { %v2078_v36 = vadd.f32 %v2077_v52, %v2076_v14  ;;  %v2147_v31 = vrot.slane %v2146_v55, 2  ;;  %p3641_p9 = pnand %p3640_p8, %p3634_p3 }
 0x265   : > { %v2412_v60 = vrot.slane %v2411_v19, 1  ;;  %v2481_v41 = vadd.f32 %v2480_v50, %v2479_v9 }
 0x266   : > { %v2079_v35 = vrot.slane %v2078_v36, 1  ;;  %v2148_v18 = vadd.f32 %v2147_v31, %v2146_v55 }
 0x267   : > { %v2413_v59 = vadd.f32 %v2412_v60, %v2411_v19  ;;  %v2482_v49 = vrot.slane %v2481_v41, 1 }
 0x268   : > { %v2080_v54 = vadd.f32 %v2079_v35, %v2078_v36  ;;  %v2149_v26 = vrot.slane %v2148_v18, 1 }
 0x269   : > { %2414 = vst [vmem:[%s235_s11 + $0x2] sm:$0x1] %v2413_v59  ;;  %v2483_v21 = vadd.f32 %v2482_v49, %v2481_v41 }
 0x26a   : > { %2081 = vst [vmem:[%s235_s11] sm:$0x1] %v2080_v54  ;;  %v2150_v6 = vadd.f32 %v2149_v26, %v2148_v18 }
 0x26b   : > { %2484 = vst [vmem:[%s235_s11 + $0x3] sm:$0x1] %v2483_v21 }
 0x26c   : > { %2151 = vst [vmem:[%s235_s11 + $0x1] sm:$0x1] %v2150_v6 }
 0x26d   : > { %3644 = shalt.err (!%p3641_p9)
}
 0x26e   : > { %s3645_s17 = scalar_lea.hbm %s4811_s16, 64  ;;  %s3649_s9 = scalar_lea.hbm %s4859_s5, 128 }
 0x26f   : > { %p3646_p10 = scmp.ne.s32.totalorder %s4811_s16, %s3645_s17  ;;  %p3650_p13 = scmp.lt.u32.totalorder %s4811_s16, %s4859_s5 }
 0x270   : > { %p3651_p0 = scmp.lt.u32.totalorder %s3649_s9, %s3645_s17  ;;  %p3653_p2 = scmp.lt.u32.totalorder %s3645_s17, %s4811_s16 }
 0x271   : > { %p3647_p11 = pnand %p3646_p10, %p3772_p5 }
 0x272   : > { %p3652_p1 = por %p3651_p0, %p3650_p13 }
 0x273   : > { %p3648_p12 = pneg %p3647_p11 }
 0x274   : > { %p3654_p3 = por %p3653_p2, %p3652_p1 }
 0x276   : > { %p3655_p4 = pnand %p3654_p3, %p3648_p12 }
 0x278   : > { %3658 = shalt.err (!%p3655_p4)
}
 0x279   : > { %3477 = dma.vmem_to_hbm [thread:$0]  (%p3772_p5), %s4813_s12, 64, %s4811_s16, %s2604_s22  }
 0x27a PF: > { %p3487_p7 = scmp.ge.s32.totalorder %s3697_s21, 2  ;;  %s2656_s7 = sand.u32 1, %s3685_s18  }
 0x27b   : > { %s2657_s11 = scalar_lea.sflag [#allocation3], %s2656_s7 }
 0x27c   : > { %p3481_p8 = pnand %p3487_p7, %p3776_p6 }
 0x27e   : > { %3676 = dma.done.wait (!%p3481_p8), %s2657_s11, 4096  }
 0x27f   : > { %3678 = vsyncadd (!%p3481_p8), %s2657_s11, 4294963200  ;;  %s2666_s14 = scalar_lea.sflag [#allocation5], %s2656_s7 }
 0x280   : > { %3680 = dma.done.wait (!%p3481_p8), %s2666_s14, 64  }
 0x281   : > { %3682 = vsyncadd (!%p3481_p8), %s2666_s14, 4294967232  ;;  %p19_p5 = scmp.ge.s32.totalorder %s3759_s24, 4   ;;  %s4877_s18 = smov %s3689_s19 }
 0x282   : > { %s4878_s19 = smov %s3693_s20  ;;  %s4879_s20 = smov %s3770_s27 }
 0x283   : > { %s4880_s21 = smov %s3759_s24  ;;  %21 = sbr.rel (!%p19_p5) target bundleno = 5 (0x5), region = 98 }
 0x28a   :  { %2671 = vsyncpa [#allocation3], 1 }
 0x28b   :  { %2673 = vsyncpa [#allocation3 + $0x1], 1 }
 0x28c   :  { %2674 = vsyncpa [#allocation5], 1 }
 0x28d   :  { %2676 = vsyncpa [#allocation5 + $0x1], 1 }

</bundles_post_ra>
